<compile_context>
chip_gen: v6e
topology: v6e:2x2x1
jax: 0.10.0
libtpu: 0.0.40
codegen_flags: <defaults>
</compile_context>

<pallas_src>
import jax
import jax.numpy as jnp
from jax import lax
from jax.experimental import pallas as pl
from jax.experimental.pallas import tpu as pltpu


def _round_up(x, m):
    return (x + m - 1) // m * m


def _pick_tn(N, C, Ns, inter_p, comp_bytes, budget=48 * 1024 * 1024):
    """Largest N-tile that divides N, is sublane-aligned, and fits the VMEM budget."""
    cands = [t for t in (1024, 512, 256, 128, 64, 32, 16, 8)
             if t <= N and N % t == 0]
    if not cands:
        return N
    resident = 2 * (4 * Ns * C) * comp_bytes + 2 * Ns * inter_p * comp_bytes
    for tn in cands:
        per_tile = (4 * tn * C * 4            # x + out tiles, double-buffered (f32)
                    + 2 * tn * Ns * 4         # f / softmax working set (f32)
                    + 2 * tn * inter_p * 4    # theta, y (f32)
                    + tn * C * 4)             # misc temporaries
        if resident + per_tile <= budget:
            return tn
    return cands[-1]


def _make_kernel(Ns, compute_dtype, approx_recip):
    def kernel(x_ref, xg_ref,
               wt_ref, bt_ref, wp_ref, bp_ref, wg_ref, bg_ref,
               ww_ref, bw_ref, scale_ref, shift_ref,
               out_ref,
               phi_scr, g_scr):
        j = pl.program_id(1)

        # --- per-batch: sub-sampled phi/g projections into resident scratch ---
        @pl.when(j == 0)
        def _():
            xg = xg_ref[0]                                   # (4*Ns, C) compute dtype

            def proj_then_pool(w, b):
                # Single fused matmul for all 4 pool offsets, then max over the
                # window; bias added after the max (== conv + MaxPool2d(2)).
                p = jnp.dot(xg, w, preferred_element_type=jnp.float32)   # (4*Ns, I)
                p = jnp.maximum(jnp.maximum(p[0 * Ns:1 * Ns], p[1 * Ns:2 * Ns]),
                                jnp.maximum(p[2 * Ns:3 * Ns], p[3 * Ns:4 * Ns]))
                return (p + b).astype(compute_dtype)                      # (Ns, I)

            phi_scr[...] = proj_then_pool(wp_ref[...], bp_ref[...])
            g_scr[...] = proj_then_pool(wg_ref[...], bg_ref[...])

        # --- per N-tile: attention for TN query positions ---
        x = x_ref[0]                                         # (TN, C) f32
        xc = x.astype(compute_dtype)

        # theta: 1x1 conv == channel matmul on the query tile.
        theta = jnp.dot(xc, wt_ref[...],
                        preferred_element_type=jnp.float32) + bt_ref[...]  # (TN, I)

        # f = theta @ phi^T  (contract over inter)
        f = lax.dot_general(theta.astype(compute_dtype), phi_scr[...],
                            dimension_numbers=(((1,), (1,)), ((), ())),
                            preferred_element_type=jnp.float32)            # (TN, Ns)

        # softmax over keys (kept in f32)
        m = jnp.max(f, axis=-1, keepdims=True)
        e = jnp.exp(f - m)
        s = jnp.sum(e, axis=-1, keepdims=True)
        if approx_recip:
            p = e * pl.reciprocal(s, approx=True)
        else:
            p = e / s

        # y = softmax(f) @ g
        y = jnp.dot(p.astype(compute_dtype), g_scr[...],
                    preferred_element_type=jnp.float32)                    # (TN, I)

        # W: 1x1 conv back to C channels, fused inference-BN affine, residual.
        wy = jnp.dot(y.astype(compute_dtype), ww_ref[...],
                     preferred_element_type=jnp.float32) + bw_ref[...]     # (TN, C)
        z = wy * scale_ref[...] + shift_ref[...] + x
        out_ref[0] = z.astype(out_ref.dtype)

    return kernel


def nonlocal_block_2d(x_nchw, params, *, compute_dtype=jnp.bfloat16, lane_pad=128):
    """Forward pass of _NonLocalBlockND (embedded_gaussian, 2D, sub_sample, bn)."""
    B, C, H, W = x_nchw.shape
    # TODO(synk): PyTorch MaxPool2d(2) silently floors odd spatial dims; not handled.
    assert H % 2 == 0 and W % 2 == 0, "even H/W required (MaxPool2d(2))"
    inter = params["w_theta"].shape[1]
    N = H * W
    Ns = (H // 2) * (W // 2)
    inter_p = _round_up(inter, lane_pad) if lane_pad else inter

    comp_bytes = jnp.dtype(compute_dtype).itemsize
    TN = _pick_tn(N, C, Ns, inter_p, comp_bytes)
    n_tiles = N // TN

    x_nhwc = jnp.transpose(x_nchw, (0, 2, 3, 1))
    x_flat = x_nhwc.reshape(B, N, C).astype(jnp.float32)
    # 2x2 pool-window gather (k = 2*dh + dw), collapsed to (B, 4*Ns, C) so the
    # kernel does one fused matmul per branch; cast to the compute dtype so the
    # duplicated copy costs half the HBM bytes.
    # TODO(synk): could be eliminated entirely with in-kernel stride-2 pooling
    # over the resident full-image block (pl.ds with stride).
    xg = x_nhwc.reshape(B, H // 2, 2, W // 2, 2, C)
    xg = jnp.transpose(xg, (0, 2, 4, 1, 3, 5)).reshape(B, 4 * Ns, C)
    xg = xg.astype(compute_dtype)

    def pad_cols(a):
        pad = inter_p - a.shape[-1]
        return a if pad == 0 else jnp.pad(a, ((0, 0), (0, pad)))

    def pad_vec(a):
        pad = inter_p - a.shape[-1]
        return a if pad == 0 else jnp.pad(a, ((0, pad),))

    # 1x1-conv weights as (Cin, Cout) channel matmuls; inter zero-padded to a
    # lane multiple (exact; zero pads contribute nothing anywhere downstream).
    wt = pad_cols(params["w_theta"]).astype(compute_dtype)
    wp = pad_cols(params["w_phi"]).astype(compute_dtype)
    wg = pad_cols(params["w_g"]).astype(compute_dtype)
    ww = jnp.pad(params["w_w"], ((0, inter_p - inter), (0, 0))).astype(compute_dtype)
    bt = pad_vec(params["b_theta"]).reshape(1, inter_p).astype(jnp.float32)
    bp = pad_vec(params["b_phi"]).reshape(1, inter_p).astype(jnp.float32)
    bg = pad_vec(params["b_g"]).reshape(1, inter_p).astype(jnp.float32)
    bw = params["b_w"].reshape(1, C).astype(jnp.float32)

    # Inference-mode BatchNorm folded into per-channel scale/shift.
    # TODO(synk): training-mode BatchNorm (batch statistics over B*H*W) not
    # implemented; inference-mode affine BN with running stats is used instead.
    eps = 1e-5
    scale = params["bn_gamma"] / jnp.sqrt(params["bn_var"] + eps)
    shift = params["bn_beta"] - params["bn_mean"] * scale
    scale2 = scale.reshape(1, C).astype(jnp.float32)
    shift2 = shift.reshape(1, C).astype(jnp.float32)

    def full_spec(arr):
        nd = arr.ndim
        return pl.BlockSpec(arr.shape, lambda b, j, _nd=nd: (0,) * _nd)

    # VMEM budget: double-buffered I/O tiles + per-batch resident xg + phi/g
    # scratch + matmul/softmax working set, with 2x headroom, clamped to stay
    # under v7x's 64 MiB physical VMEM.
    vmem_est = (4 * TN * C * 4
                + 2 * 4 * Ns * C * comp_bytes
                + 2 * Ns * inter_p * comp_bytes
                + 2 * TN * Ns * 4
                + 2 * TN * inter_p * 4
                + 4 * C * inter_p * comp_bytes
                + 8 * inter_p * 4
                + TN * C * 4)
    vmem_limit = int(min(max(2 * vmem_est, 8 * 1024 * 1024), 60 * 1024 * 1024))

    approx_recip = jnp.dtype(compute_dtype) != jnp.dtype(jnp.float32)
    kernel = _make_kernel(Ns, compute_dtype, approx_recip)

    # NOTE: for v7x with very small B, making the N-tile axis the parallel one
    # (recomputing phi/g per tile) would keep both TensorCores busy.
    out_flat = pl.pallas_call(
        kernel,
        out_shape=jax.ShapeDtypeStruct((B, N, C), x_nchw.dtype),
        grid_spec=pltpu.PrefetchScalarGridSpec(
            num_scalar_prefetch=0,
            grid=(B, n_tiles),
            in_specs=[
                pl.BlockSpec((1, TN, C), lambda b, j: (b, j, 0)),
                pl.BlockSpec((1, 4 * Ns, C), lambda b, j: (b, 0, 0)),
                full_spec(wt), full_spec(bt),
                full_spec(wp), full_spec(bp),
                full_spec(wg), full_spec(bg),
                full_spec(ww), full_spec(bw),
                full_spec(scale2), full_spec(shift2),
            ],
            out_specs=pl.BlockSpec((1, TN, C), lambda b, j: (b, j, 0)),
            scratch_shapes=[pltpu.VMEM((Ns, inter_p), compute_dtype),
                            pltpu.VMEM((Ns, inter_p), compute_dtype)],
        ),
        compiler_params=pltpu.CompilerParams(
            dimension_semantics=("parallel", "arbitrary"),
            vmem_limit_bytes=vmem_limit),
    )(x_flat, xg, wt, bt, wp, bp, wg, bg, ww, bw, scale2, shift2)

    return out_flat.reshape(B, H, W, C).transpose(0, 3, 1, 2)


def make_params(key, C, inter):
    ks = jax.random.split(key, 8)

    def w(k, shape, s=0.1):
        return (s * jax.random.normal(k, shape)).astype(jnp.float32)

    return dict(
        w_theta=w(ks[0], (C, inter)), b_theta=w(ks[1], (inter,)),
        w_phi=w(ks[2], (C, inter)), b_phi=w(ks[3], (inter,)),
        w_g=w(ks[4], (C, inter)), b_g=w(ks[5], (inter,)),
        w_w=w(ks[6], (inter, C)), b_w=w(ks[7], (C,)),
        # NOTE: the PyTorch __init__ sets BN gamma=beta=0, which would make
        # W_y == 0 and z == x. We use nonzero deterministic BN params so the
        # kernel is actually exercised.
        bn_gamma=jnp.linspace(0.5, 1.5, C, dtype=jnp.float32),
        bn_beta=jnp.linspace(-0.1, 0.1, C, dtype=jnp.float32),
        bn_mean=jnp.zeros((C,), jnp.float32),
        bn_var=jnp.ones((C,), jnp.float32),
    )


def reference(x, params):
    """Pure-JAX mirror of _NonLocalBlockND._embedded_gaussian (NCHW, f32)."""
    B, C, H, W = x.shape
    inter = params["w_theta"].shape[1]

    def conv1x1(t, w, b):  # w: (Cin, Cout)
        return jnp.einsum("bchw,co->bohw", t, w) + b[None, :, None, None]

    def maxpool2(t):
        Bb, K, Hh, Ww = t.shape
        return t.reshape(Bb, K, Hh // 2, 2, Ww // 2, 2).max(axis=(3, 5))

    g = maxpool2(conv1x1(x, params["w_g"], params["b_g"]))
    g_x = g.reshape(B, inter, -1).transpose(0, 2, 1)             # (B, Ns, inter)
    theta = conv1x1(x, params["w_theta"], params["b_theta"])
    theta_x = theta.reshape(B, inter, -1).transpose(0, 2, 1)     # (B, N, inter)
    phi = maxpool2(conv1x1(x, params["w_phi"], params["b_phi"]))
    phi_x = phi.reshape(B, inter, -1)                            # (B, inter, Ns)

    f = jnp.einsum("bni,bis->bns", theta_x, phi_x)
    f = jax.nn.softmax(f, axis=-1)
    y = jnp.einsum("bns,bsi->bni", f, g_x)
    y = y.transpose(0, 2, 1).reshape(B, inter, H, W)

    wy = conv1x1(y, params["w_w"], params["b_w"])
    eps = 1e-5
    scale = params["bn_gamma"] / jnp.sqrt(params["bn_var"] + eps)
    shift = params["bn_beta"] - params["bn_mean"] * scale
    wy = wy * scale[None, :, None, None] + shift[None, :, None, None]
    return wy + x


if __name__ == "__main__":
    key = jax.random.PRNGKey(0)
    kx, kp = jax.random.split(key)

    B, C, H, W = 2, 4, 16, 16          # in_channels=4 -> inter_channels=2
    x = jax.random.normal(kx, (B, C, H, W), dtype=jnp.float32)
    params = make_params(kp, C, C // 2)

    ref = reference(x, params)

    # 1) f32-operand path: tight numerical check against the pure-JAX reference.
    out_f32 = jax.block_until_ready(
        nonlocal_block_2d(x, params, compute_dtype=jnp.float32))
    assert out_f32.shape == x.shape
    err32 = float(jnp.max(jnp.abs(out_f32 - ref)))
    assert jnp.allclose(out_f32, ref, atol=1e-4, rtol=1e-4), f"f32 max abs err {err32}"

    # 2) default fast path: bf16 MXU operands, f32 softmax/accumulation.
    out_bf = jax.block_until_ready(nonlocal_block_2d(x, params))
    err_bf = float(jnp.max(jnp.abs(out_bf - ref)))
    assert jnp.allclose(out_bf, ref, atol=3e-2, rtol=3e-2), f"bf16 max abs err {err_bf}"

    print("KERNEL_OK")
</pallas_src>

<mosaic_0001>
module attributes {stable_mosaic.version = 11 : i64} {
  func.func @kernel(%arg0: i32, %arg1: i32, %arg2: memref<1x256x4xf32, #tpu.memory_space<vmem>>, %arg3: memref<1x256x4xf32, #tpu.memory_space<vmem>>, %arg4: memref<4x128xf32, #tpu.memory_space<vmem>>, %arg5: memref<1x128xf32, #tpu.memory_space<vmem>>, %arg6: memref<4x128xf32, #tpu.memory_space<vmem>>, %arg7: memref<1x128xf32, #tpu.memory_space<vmem>>, %arg8: memref<4x128xf32, #tpu.memory_space<vmem>>, %arg9: memref<1x128xf32, #tpu.memory_space<vmem>>, %arg10: memref<128x4xf32, #tpu.memory_space<vmem>>, %arg11: memref<1x4xf32, #tpu.memory_space<vmem>>, %arg12: memref<1x4xf32, #tpu.memory_space<vmem>>, %arg13: memref<1x4xf32, #tpu.memory_space<vmem>>, %arg14: memref<1x256x4xf32, #tpu.memory_space<vmem>>, %arg15: memref<64x128xf32, #tpu.memory_space<vmem>>, %arg16: memref<64x128xf32, #tpu.memory_space<vmem>>) attributes {dimension_semantics = [#tpu.dimension_semantics<parallel>, #tpu.dimension_semantics<arbitrary>], iteration_bounds = array<i64: 2, 1>, scalar_prefetch = 0 : i64, scratch_operands = 2 : i64, tpu.core_type = #tpu.core_type<tc>, window_params = [{transform_indices = @transform_0, window_bounds = array<i64: 1, 256, 4>}, {transform_indices = @transform_1, window_bounds = array<i64: 1, 256, 4>}, {pipeline_mode = #tpu.pipeline_mode<synchronous>, transform_indices = @transform_2, window_bounds = array<i64: 4, 128>}, {pipeline_mode = #tpu.pipeline_mode<synchronous>, transform_indices = @transform_3, window_bounds = array<i64: 1, 128>}, {pipeline_mode = #tpu.pipeline_mode<synchronous>, transform_indices = @transform_4, window_bounds = array<i64: 4, 128>}, {pipeline_mode = #tpu.pipeline_mode<synchronous>, transform_indices = @transform_5, window_bounds = array<i64: 1, 128>}, {pipeline_mode = #tpu.pipeline_mode<synchronous>, transform_indices = @transform_6, window_bounds = array<i64: 4, 128>}, {pipeline_mode = #tpu.pipeline_mode<synchronous>, transform_indices = @transform_7, window_bounds = array<i64: 1, 128>}, {pipeline_mode = #tpu.pipeline_mode<synchronous>, transform_indices = @transform_8, window_bounds = array<i64: 128, 4>}, {pipeline_mode = #tpu.pipeline_mode<synchronous>, transform_indices = @transform_9, window_bounds = array<i64: 1, 4>}, {pipeline_mode = #tpu.pipeline_mode<synchronous>, transform_indices = @transform_10, window_bounds = array<i64: 1, 4>}, {pipeline_mode = #tpu.pipeline_mode<synchronous>, transform_indices = @transform_11, window_bounds = array<i64: 1, 4>}, {transform_indices = @transform_12, window_bounds = array<i64: 1, 256, 4>}]} {
    %c0_i32 = arith.constant 0 : i32
    %0 = arith.cmpi eq, %arg1, %c0_i32 : i32
    %1 = arith.extui %0 : i1 to i32
    %c0_i32_0 = arith.constant 0 : i32
    %2 = arith.cmpi ne, %1, %c0_i32_0 : i32
    scf.if %2 {
      %c0_27 = arith.constant 0 : index
      %c0_28 = arith.constant 0 : index
      %c0_29 = arith.constant 0 : index
      %38 = vector.load %arg3[%c0_27, %c0_28, %c0_29] : memref<1x256x4xf32, #tpu.memory_space<vmem>>, vector<1x256x4xf32>
      %39 = vector.shape_cast %38 : vector<1x256x4xf32> to vector<256x4xf32>
      %c0_30 = arith.constant 0 : index
      %c0_31 = arith.constant 0 : index
      %40 = vector.load %arg6[%c0_30, %c0_31] : memref<4x128xf32, #tpu.memory_space<vmem>>, vector<4x128xf32>
      %c0_32 = arith.constant 0 : index
      %c0_33 = arith.constant 0 : index
      %41 = vector.load %arg7[%c0_32, %c0_33] : memref<1x128xf32, #tpu.memory_space<vmem>>, vector<1x128xf32>
      %cst_34 = arith.constant dense<0.000000e+00> : vector<256x128xf32>
      %42 = tpu.matmul %39, %40, %cst_34 {dimension_numbers = #tpu.dot_dimension_numbers<[1], [0], [0], [1], [0, 0, 1, 1], [], []>} : vector<256x4xf32>, vector<4x128xf32>, vector<256x128xf32> -> vector<256x128xf32>
      %43 = vector.extract_strided_slice %42 {offsets = [0, 0], sizes = [64, 128], strides = [1, 1]} : vector<256x128xf32> to vector<64x128xf32>
      %44 = vector.extract_strided_slice %42 {offsets = [64, 0], sizes = [64, 128], strides = [1, 1]} : vector<256x128xf32> to vector<64x128xf32>
      %45 = arith.maximumf %43, %44 : vector<64x128xf32>
      %46 = vector.extract_strided_slice %42 {offsets = [128, 0], sizes = [64, 128], strides = [1, 1]} : vector<256x128xf32> to vector<64x128xf32>
      %47 = vector.extract_strided_slice %42 {offsets = [192, 0], sizes = [64, 128], strides = [1, 1]} : vector<256x128xf32> to vector<64x128xf32>
      %48 = arith.maximumf %46, %47 : vector<64x128xf32>
      %49 = arith.maximumf %45, %48 : vector<64x128xf32>
      %50 = vector.broadcast %41 : vector<1x128xf32> to vector<64x128xf32>
      %51 = arith.addf %49, %50 : vector<64x128xf32>
      %c0_35 = arith.constant 0 : index
      %c0_36 = arith.constant 0 : index
      %52 = vector.load %arg15[%c0_35, %c0_36] : memref<64x128xf32, #tpu.memory_space<vmem>>, vector<64x128xf32>
      tpu.vector_store %arg15[%c0_35, %c0_36], %51 {strides = array<i32>} : memref<64x128xf32, #tpu.memory_space<vmem>>, vector<64x128xf32>,
      %c0_37 = arith.constant 0 : index
      %c0_38 = arith.constant 0 : index
      %53 = vector.load %arg8[%c0_37, %c0_38] : memref<4x128xf32, #tpu.memory_space<vmem>>, vector<4x128xf32>
      %c0_39 = arith.constant 0 : index
      %c0_40 = arith.constant 0 : index
      %54 = vector.load %arg9[%c0_39, %c0_40] : memref<1x128xf32, #tpu.memory_space<vmem>>, vector<1x128xf32>
      %cst_41 = arith.constant dense<0.000000e+00> : vector<256x128xf32>
      %55 = tpu.matmul %39, %53, %cst_41 {dimension_numbers = #tpu.dot_dimension_numbers<[1], [0], [0], [1], [0, 0, 1, 1], [], []>} : vector<256x4xf32>, vector<4x128xf32>, vector<256x128xf32> -> vector<256x128xf32>
      %56 = vector.extract_strided_slice %55 {offsets = [0, 0], sizes = [64, 128], strides = [1, 1]} : vector<256x128xf32> to vector<64x128xf32>
      %57 = vector.extract_strided_slice %55 {offsets = [64, 0], sizes = [64, 128], strides = [1, 1]} : vector<256x128xf32> to vector<64x128xf32>
      %58 = arith.maximumf %56, %57 : vector<64x128xf32>
      %59 = vector.extract_strided_slice %55 {offsets = [128, 0], sizes = [64, 128], strides = [1, 1]} : vector<256x128xf32> to vector<64x128xf32>
      %60 = vector.extract_strided_slice %55 {offsets = [192, 0], sizes = [64, 128], strides = [1, 1]} : vector<256x128xf32> to vector<64x128xf32>
      %61 = arith.maximumf %59, %60 : vector<64x128xf32>
      %62 = arith.maximumf %58, %61 : vector<64x128xf32>
      %63 = vector.broadcast %54 : vector<1x128xf32> to vector<64x128xf32>
      %64 = arith.addf %62, %63 : vector<64x128xf32>
      %c0_42 = arith.constant 0 : index
      %c0_43 = arith.constant 0 : index
      %65 = vector.load %arg16[%c0_42, %c0_43] : memref<64x128xf32, #tpu.memory_space<vmem>>, vector<64x128xf32>
      tpu.vector_store %arg16[%c0_42, %c0_43], %64 {strides = array<i32>} : memref<64x128xf32, #tpu.memory_space<vmem>>, vector<64x128xf32>,
    } else {
    }
    %c0 = arith.constant 0 : index
    %c0_1 = arith.constant 0 : index
    %c0_2 = arith.constant 0 : index
    %3 = vector.load %arg2[%c0, %c0_1, %c0_2] : memref<1x256x4xf32, #tpu.memory_space<vmem>>, vector<1x256x4xf32>
    %4 = vector.shape_cast %3 : vector<1x256x4xf32> to vector<256x4xf32>
    %c0_3 = arith.constant 0 : index
    %c0_4 = arith.constant 0 : index
    %5 = vector.load %arg4[%c0_3, %c0_4] : memref<4x128xf32, #tpu.memory_space<vmem>>, vector<4x128xf32>
    %cst = arith.constant dense<0.000000e+00> : vector<256x128xf32>
    %6 = tpu.matmul %4, %5, %cst {dimension_numbers = #tpu.dot_dimension_numbers<[1], [0], [0], [1], [0, 0, 1, 1], [], []>} : vector<256x4xf32>, vector<4x128xf32>, vector<256x128xf32> -> vector<256x128xf32>
    %c0_5 = arith.constant 0 : index
    %c0_6 = arith.constant 0 : index
    %7 = vector.load %arg5[%c0_5, %c0_6] : memref<1x128xf32, #tpu.memory_space<vmem>>, vector<1x128xf32>
    %8 = vector.broadcast %7 : vector<1x128xf32> to vector<256x128xf32>
    %9 = arith.addf %6, %8 : vector<256x128xf32>
    %c0_7 = arith.constant 0 : index
    %c0_8 = arith.constant 0 : index
    %10 = vector.load %arg15[%c0_7, %c0_8] : memref<64x128xf32, #tpu.memory_space<vmem>>, vector<64x128xf32>
    %cst_9 = arith.constant dense<0.000000e+00> : vector<256x64xf32>
    %11 = tpu.matmul %9, %10, %cst_9 {dimension_numbers = #tpu.dot_dimension_numbers<[1], [1], [0], [0], [0, 0, 1, 0], [], []>} : vector<256x128xf32>, vector<64x128xf32>, vector<256x64xf32> -> vector<256x64xf32>
    %cst_10 = arith.constant dense<0xFF800000> : vector<256xf32>
    %12 = vector.multi_reduction <maximumf>, %11, %cst_10 [1] : vector<256x64xf32> to vector<256xf32>
    %13 = vector.shape_cast %12 : vector<256xf32> to vector<256x1xf32>
    %14 = vector.broadcast %13 : vector<256x1xf32> to vector<256x64xf32>
    %15 = arith.subf %11, %14 : vector<256x64xf32>
    %16 = math.exp %15 : vector<256x64xf32>
    %cst_11 = arith.constant dense<0.000000e+00> : vector<256xf32>
    %17 = vector.multi_reduction <add>, %16, %cst_11 [1] : vector<256x64xf32> to vector<256xf32>
    %18 = vector.shape_cast %17 : vector<256xf32> to vector<256x1xf32>
    %19 = vector.broadcast %18 : vector<256x1xf32> to vector<256x64xf32>
    %20 = arith.divf %16, %19 : vector<256x64xf32>
    %c0_12 = arith.constant 0 : index
    %c0_13 = arith.constant 0 : index
    %21 = vector.load %arg16[%c0_12, %c0_13] : memref<64x128xf32, #tpu.memory_space<vmem>>, vector<64x128xf32>
    %cst_14 = arith.constant dense<0.000000e+00> : vector<256x128xf32>
    %22 = tpu.matmul %20, %21, %cst_14 {dimension_numbers = #tpu.dot_dimension_numbers<[1], [0], [0], [1], [0, 0, 1, 1], [], []>} : vector<256x64xf32>, vector<64x128xf32>, vector<256x128xf32> -> vector<256x128xf32>
    %c0_15 = arith.constant 0 : index
    %c0_16 = arith.constant 0 : index
    %23 = vector.load %arg10[%c0_15, %c0_16] : memref<128x4xf32, #tpu.memory_space<vmem>>, vector<128x4xf32>
    %cst_17 = arith.constant dense<0.000000e+00> : vector<256x4xf32>
    %24 = tpu.matmul %22, %23, %cst_17 {dimension_numbers = #tpu.dot_dimension_numbers<[1], [0], [0], [1], [0, 0, 1, 1], [], []>} : vector<256x128xf32>, vector<128x4xf32>, vector<256x4xf32> -> vector<256x4xf32>
    %c0_18 = arith.constant 0 : index
    %c0_19 = arith.constant 0 : index
    %25 = vector.load %arg11[%c0_18, %c0_19] : memref<1x4xf32, #tpu.memory_space<vmem>>, vector<1x4xf32>
    %26 = vector.broadcast %25 : vector<1x4xf32> to vector<256x4xf32>
    %27 = arith.addf %24, %26 : vector<256x4xf32>
    %c0_20 = arith.constant 0 : index
    %c0_21 = arith.constant 0 : index
    %28 = vector.load %arg12[%c0_20, %c0_21] : memref<1x4xf32, #tpu.memory_space<vmem>>, vector<1x4xf32>
    %29 = vector.broadcast %28 : vector<1x4xf32> to vector<256x4xf32>
    %30 = arith.mulf %27, %29 : vector<256x4xf32>
    %c0_22 = arith.constant 0 : index
    %c0_23 = arith.constant 0 : index
    %31 = vector.load %arg13[%c0_22, %c0_23] : memref<1x4xf32, #tpu.memory_space<vmem>>, vector<1x4xf32>
    %32 = vector.broadcast %31 : vector<1x4xf32> to vector<256x4xf32>
    %33 = arith.addf %30, %32 : vector<256x4xf32>
    %34 = arith.addf %33, %4 : vector<256x4xf32>
    %c0_24 = arith.constant 0 : index
    %c0_25 = arith.constant 0 : index
    %c0_26 = arith.constant 0 : index
    %35 = vector.load %arg14[%c0_24, %c0_25, %c0_26] : memref<1x256x4xf32, #tpu.memory_space<vmem>>, vector<1x256x4xf32>
    %36 = vector.shape_cast %35 : vector<1x256x4xf32> to vector<256x4xf32>
    %37 = vector.shape_cast %34 : vector<256x4xf32> to vector<1x256x4xf32>
    tpu.vector_store %arg14[%c0_24, %c0_25, %c0_26], %37 {strides = array<i32>} : memref<1x256x4xf32, #tpu.memory_space<vmem>>, vector<1x256x4xf32>,
    return
  }
  func.func @transform_0(%arg0: i32, %arg1: i32) -> (i32, i32, i32) {
    %c0_i32 = arith.constant 0 : i32
    %c0_i32_0 = arith.constant 0 : i32
    return %arg0, %arg1, %c0_i32 : i32, i32, i32
  }
  func.func @transform_1(%arg0: i32, %arg1: i32) -> (i32, i32, i32) {
    %c0_i32 = arith.constant 0 : i32
    %c0_i32_0 = arith.constant 0 : i32
    %c0_i32_1 = arith.constant 0 : i32
    return %arg0, %c0_i32, %c0_i32_0 : i32, i32, i32
  }
  func.func @transform_2(%arg0: i32, %arg1: i32) -> (i32, i32) {
    %c0_i32 = arith.constant 0 : i32
    %c0_i32_0 = arith.constant 0 : i32
    %c0_i32_1 = arith.constant 0 : i32
    return %c0_i32, %c0_i32_0 : i32, i32
  }
  func.func @transform_3(%arg0: i32, %arg1: i32) -> (i32, i32) {
    %c0_i32 = arith.constant 0 : i32
    %c0_i32_0 = arith.constant 0 : i32
    %c0_i32_1 = arith.constant 0 : i32
    return %c0_i32, %c0_i32_0 : i32, i32
  }
  func.func @transform_4(%arg0: i32, %arg1: i32) -> (i32, i32) {
    %c0_i32 = arith.constant 0 : i32
    %c0_i32_0 = arith.constant 0 : i32
    %c0_i32_1 = arith.constant 0 : i32
    return %c0_i32, %c0_i32_0 : i32, i32
  }
  func.func @transform_5(%arg0: i32, %arg1: i32) -> (i32, i32) {
    %c0_i32 = arith.constant 0 : i32
    %c0_i32_0 = arith.constant 0 : i32
    %c0_i32_1 = arith.constant 0 : i32
    return %c0_i32, %c0_i32_0 : i32, i32
  }
  func.func @transform_6(%arg0: i32, %arg1: i32) -> (i32, i32) {
    %c0_i32 = arith.constant 0 : i32
    %c0_i32_0 = arith.constant 0 : i32
    %c0_i32_1 = arith.constant 0 : i32
    return %c0_i32, %c0_i32_0 : i32, i32
  }
  func.func @transform_7(%arg0: i32, %arg1: i32) -> (i32, i32) {
    %c0_i32 = arith.constant 0 : i32
    %c0_i32_0 = arith.constant 0 : i32
    %c0_i32_1 = arith.constant 0 : i32
    return %c0_i32, %c0_i32_0 : i32, i32
  }
  func.func @transform_8(%arg0: i32, %arg1: i32) -> (i32, i32) {
    %c0_i32 = arith.constant 0 : i32
    %c0_i32_0 = arith.constant 0 : i32
    %c0_i32_1 = arith.constant 0 : i32
    return %c0_i32, %c0_i32_0 : i32, i32
  }
  func.func @transform_9(%arg0: i32, %arg1: i32) -> (i32, i32) {
    %c0_i32 = arith.constant 0 : i32
    %c0_i32_0 = arith.constant 0 : i32
    %c0_i32_1 = arith.constant 0 : i32
    return %c0_i32, %c0_i32_0 : i32, i32
  }
  func.func @transform_10(%arg0: i32, %arg1: i32) -> (i32, i32) {
    %c0_i32 = arith.constant 0 : i32
    %c0_i32_0 = arith.constant 0 : i32
    %c0_i32_1 = arith.constant 0 : i32
    return %c0_i32, %c0_i32_0 : i32, i32
  }
  func.func @transform_11(%arg0: i32, %arg1: i32) -> (i32, i32) {
    %c0_i32 = arith.constant 0 : i32
    %c0_i32_0 = arith.constant 0 : i32
    %c0_i32_1 = arith.constant 0 : i32
    return %c0_i32, %c0_i32_0 : i32, i32
  }
  func.func @transform_12(%arg0: i32, %arg1: i32) -> (i32, i32, i32) {
    %c0_i32 = arith.constant 0 : i32
    %c0_i32_0 = arith.constant 0 : i32
    return %arg0, %arg1, %c0_i32 : i32, i32, i32
  }
}

</mosaic_0001>

<bundles_post_ra>
// kernel: tpu_custom_call.1
= control target key start
LH: loop header
LB: loop body
LE: loop exit
PB: predicated region body
PF: predicated region fallthrough
CT: control target
= control target key end

     0   :  { %s3940_s21 = smov 0   ;;  %s3942_s22 = smov 0   ;;  %s4993_s0 = inlined_call_operand.vmem [shape: f32[2,256,4], index: 0, kind: input, shape index: {}]   ;;  %s4994_s1 = inlined_call_operand.vmem [shape: f32[2,256,4], index: 1, kind: input, shape index: {}]   ;;  %s4995_s2 = inlined_call_operand.vmem [shape: f32[4,128], index: 2, kind: input, shape index: {}]   ;;  %s4996_s3 = inlined_call_operand.vmem [shape: f32[1,128], index: 3, kind: input, shape index: {}]   ;;  %s4997_s4 = inlined_call_operand.vmem [shape: f32[4,128], index: 4, kind: input, shape index: {}]   ;;  %s4998_s5 = inlined_call_operand.vmem [shape: f32[1,128], index: 5, kind: input, shape index: {}]   ;;  %s4999_s6 = inlined_call_operand.vmem [shape: f32[4,128], index: 6, kind: input, shape index: {}]   ;;  %s5000_s7 = inlined_call_operand.vmem [shape: f32[1,128], index: 7, kind: input, shape index: {}]   ;;  %s5001_s8 = inlined_call_operand.vmem [shape: f32[128,4], index: 8, kind: input, shape index: {}]   ;;  %s5002_s9 = inlined_call_operand.vmem [shape: f32[1,4], index: 9, kind: input, shape index: {}]   ;;  %s5003_s10 = inlined_call_operand.vmem [shape: f32[1,4], index: 10, kind: input, shape index: {}]   ;;  %s5004_s11 = inlined_call_operand.vmem [shape: f32[1,4], index: 11, kind: input, shape index: {}]   ;;  %s5005_s12 = inlined_call_operand.vmem [shape: f32[2,256,4], index: 12, kind: output, shape index: {}]  }
   0x1   :  { %s3944_s23 = smov 0  }
   0x2 LB: > { %s34_s24 = sadd.s32 1, %s3869_s22  ;;  %p2933_p0 = scmp.ge.s32.totalorder %s3873_s23, 1  ;;  %s3873_s23 = sphi %s3944_s23, %s22_s23   ;;  %s3869_s22 = sphi %s3942_s22, %s5007_s22   ;;  %s3865_s21 = sphi %s3940_s21, %s5006_s21  }
   0x3   : > { %p36_p1 = scmp.ge.s32.totalorder %s34_s24, 2  ;;  %p393_p2 = scmp.lt.s32.totalorder %s3873_s23, 3 }
   0x5   : > { %s5009_s24 = smov (%p36_p1, %s34_s24), 0  ;;  %p394_p3 = pnand %p2933_p0, %p393_p2 }
   0x6   : > { %p449_p4 = scmp.lt.s32.totalorder (!%p394_p3), %s3865_s21, 1 }
   0x7   : > { %397 = sbr.rel (%p394_p3) target bundleno = 1279 (0x4ff), region = 68 }
   0xc   : > { %v509_v0 = vld [vmem:[%s4997_s4] sm:$0xf]  ;;  %vm608_vm0 = vcmask 1043456   ;;  %s5011_s21 = smov (!%p449_p4, %s3865_s21), 1  ;;  %vm511_vm1 = vcmask 31744   ;;  %vm1758_vm2 = vcmask 523264  }
   0xd   : > { %3309 = vmatprep.subr.msk.mxu0 %vm608_vm0, %v509_v0  ;;  %v1191_v1 = vld [vmem:[%s4995_s2] sm:$0xf]  ;;  %s3967_s29 = sshll.u32 %s5011_s21, 8 }
   0xe   : > { %3310 = vmatpush3.msk.msra.mxu0 %vm608_vm0, %v509_v0  ;;  %v883_v2 = vld [vmem:[%s4999_s6] sm:$0xf]  ;;  %s3976_s16 = scalar_lea.vmem %s4994_s1, %s3967_s29  ;;  %s4074_s19 = scalar_lea.vmem %s4993_s0, %s3967_s29 }
   0xf   : > { %3409 = vmatprep.subr.msk.mxu0 %vm608_vm0, %v1191_v1  ;;  %3359 = vmatprep.subr.msk.mxu1 %vm608_vm0, %v883_v2  ;;  %v477_v3 = vld [vmem:[%s3976_s16] sm:$0xff]  ;;  %v478_v4 = vld [vmem:[%s3976_s16 + $0x8] sm:$0xff]  ;;  %v479_v5 = vld [vmem:[%s3976_s16 + $0x10] sm:$0xff]  ;;  %s4796_s13 = scalar_lea.vmem %s5005_s12, %s3967_s29 }
  0x10   : > { %3360 = vmatpush3.msk.msra.mxu1 %vm608_vm0, %v883_v2  ;;  %3311 = vmatprep.mubr.msk.f32.mxu0 %vm511_vm1, %v477_v3  ;;  %v480_v6 = vld [vmem:[%s3976_s16 + $0x18] sm:$0xff]  ;;  %v481_v7 = vld [vmem:[%s3976_s16 + $0x20] sm:$0xff]  ;;  %v482_v8 = vld [vmem:[%s3976_s16 + $0x28] sm:$0xff] }
  0x11   : > { %3361 = vmatprep.mubr.msk.f32.mxu1 %vm511_vm1, %v477_v3  ;;  %3312 = vmatmul.mubr.msk.f32.vlgmr.msra.gmra.mxu0 %vm511_vm1, %v478_v4  ;;  %v483_v9 = vld [vmem:[%s3976_s16 + $0x30] sm:$0xff]  ;;  %v484_v10 = vld [vmem:[%s3976_s16 + $0x38] sm:$0xff]  ;;  %v485_v11 = vld [vmem:[%s3976_s16 + $0x40] sm:$0xff] }
  0x12   : > { %3362 = vmatmul.mubr.msk.f32.vlgmr.msra.gmra.mxu1 %vm511_vm1, %v478_v4  ;;  %3314 = vmatprep.mubr.msk.f32.mxu0 %vm511_vm1, %v479_v5  ;;  %v486_v12 = vld [vmem:[%s3976_s16 + $0x48] sm:$0xff]  ;;  %v487_v13 = vld [vmem:[%s3976_s16 + $0x50] sm:$0xff]  ;;  %v488_v14 = vld [vmem:[%s3976_s16 + $0x58] sm:$0xff] }
  0x13   : > { %3410 = vmatpush3.msk.msra.mxu0 %vm608_vm0, %v1191_v1  ;;  %3364 = vmatprep.mubr.msk.f32.mxu1 %vm511_vm1, %v479_v5  ;;  %v489_v15 = vld [vmem:[%s3976_s16 + $0x60] sm:$0xff]  ;;  %v490_v16 = vld [vmem:[%s3976_s16 + $0x68] sm:$0xff]  ;;  %v491_v17 = vld [vmem:[%s3976_s16 + $0x70] sm:$0xff] }
  0x14   : > { %v492_v18 = vld [vmem:[%s3976_s16 + $0x78] sm:$0xff]  ;;  %v493_v19 = vld [vmem:[%s3976_s16 + $0x80] sm:$0xff]  ;;  %v494_v20 = vld [vmem:[%s3976_s16 + $0x88] sm:$0xff] }
  0x15   : > { %3315 = vmatmul.mubr.msk.f32.gmra.mxu0 %vm511_vm1, %v480_v6  ;;  %v495_v21 = vld [vmem:[%s3976_s16 + $0x90] sm:$0xff]  ;;  %v496_v22 = vld [vmem:[%s3976_s16 + $0x98] sm:$0xff]  ;;  %v497_v23 = vld [vmem:[%s3976_s16 + $0xa0] sm:$0xff] }
  0x16   : > { %3365 = vmatmul.mubr.msk.f32.gmra.mxu1 %vm511_vm1, %v480_v6  ;;  %3317 = vmatprep.mubr.msk.f32.mxu0 %vm511_vm1, %v481_v7  ;;  %v498_v24 = vld [vmem:[%s3976_s16 + $0xa8] sm:$0xff]  ;;  %v499_v25 = vld [vmem:[%s3976_s16 + $0xb0] sm:$0xff]  ;;  %v500_v26 = vld [vmem:[%s3976_s16 + $0xb8] sm:$0xff] }
  0x17   : > { %3367 = vmatprep.mubr.msk.f32.mxu1 %vm511_vm1, %v481_v7  ;;  %v501_v27 = vld [vmem:[%s3976_s16 + $0xc0] sm:$0xff]  ;;  %v502_v28 = vld [vmem:[%s3976_s16 + $0xc8] sm:$0xff]  ;;  %v503_v29 = vld [vmem:[%s3976_s16 + $0xd0] sm:$0xff] }
  0x18   : > { %v504_v30 = vld [vmem:[%s3976_s16 + $0xd8] sm:$0xff]  ;;  %v505_v31 = vld [vmem:[%s3976_s16 + $0xe0] sm:$0xff]  ;;  %v506_v32 = vld [vmem:[%s3976_s16 + $0xe8] sm:$0xff] }
  0x19   : > { %3318 = vmatmul.mubr.msk.f32.gmra.mxu0 %vm511_vm1, %v482_v8  ;;  %v507_v33 = vld [vmem:[%s3976_s16 + $0xf0] sm:$0xff]  ;;  %v508_v34 = vld [vmem:[%s3976_s16 + $0xf8] sm:$0xff]  ;;  %v1159_v35 = vld [vmem:[%s4074_s19] sm:$0xff] }
  0x1a   : > { %3368 = vmatmul.mubr.msk.f32.gmra.mxu1 %vm511_vm1, %v482_v8  ;;  %3320 = vmatprep.mubr.msk.f32.mxu0 %vm511_vm1, %v483_v9  ;;  %v1160_v36 = vld [vmem:[%s4074_s19 + $0x8] sm:$0xff]  ;;  %v1161_v37 = vld [vmem:[%s4074_s19 + $0x10] sm:$0xff]  ;;  %v1162_v38 = vld [vmem:[%s4074_s19 + $0x18] sm:$0xff] }
  0x1b   : > { %3370 = vmatprep.mubr.msk.f32.mxu1 %vm511_vm1, %v483_v9  ;;  %v1163_v39 = vld [vmem:[%s4074_s19 + $0x20] sm:$0xff]  ;;  %v1164_v40 = vld [vmem:[%s4074_s19 + $0x28] sm:$0xff]  ;;  %v1165_v41 = vld [vmem:[%s4074_s19 + $0x30] sm:$0xff] }
  0x1c   : > { %v1166_v42 = vld [vmem:[%s4074_s19 + $0x38] sm:$0xff]  ;;  %v1167_v43 = vld [vmem:[%s4074_s19 + $0x40] sm:$0xff]  ;;  %v1168_v44 = vld [vmem:[%s4074_s19 + $0x48] sm:$0xff] }
  0x1d   : > { %3321 = vmatmul.mubr.msk.f32.gmra.mxu0 %vm511_vm1, %v484_v10  ;;  %v1169_v45 = vld [vmem:[%s4074_s19 + $0x50] sm:$0xff]  ;;  %v1170_v46 = vld [vmem:[%s4074_s19 + $0x58] sm:$0xff]  ;;  %v1171_v47 = vld [vmem:[%s4074_s19 + $0x60] sm:$0xff] }
  0x1e   : > { %3371 = vmatmul.mubr.msk.f32.gmra.mxu1 %vm511_vm1, %v484_v10  ;;  %3323 = vmatprep.mubr.msk.f32.mxu0 %vm511_vm1, %v485_v11  ;;  %v1172_v48 = vld [vmem:[%s4074_s19 + $0x68] sm:$0xff]  ;;  %v1173_v49 = vld [vmem:[%s4074_s19 + $0x70] sm:$0xff]  ;;  %v1174_v50 = vld [vmem:[%s4074_s19 + $0x78] sm:$0xff] }
  0x1f   : > { %3373 = vmatprep.mubr.msk.f32.mxu1 %vm511_vm1, %v485_v11  ;;  %v1175_v51 = vld [vmem:[%s4074_s19 + $0x80] sm:$0xff]  ;;  %v1176_v52 = vld [vmem:[%s4074_s19 + $0x88] sm:$0xff]  ;;  %v1177_v53 = vld [vmem:[%s4074_s19 + $0x90] sm:$0xff] }
  0x20   : > { %v1178_v54 = vld [vmem:[%s4074_s19 + $0x98] sm:$0xff]  ;;  %v1179_v55 = vld [vmem:[%s4074_s19 + $0xa0] sm:$0xff]  ;;  %v1180_v56 = vld [vmem:[%s4074_s19 + $0xa8] sm:$0xff] }
  0x21   : > { %3324 = vmatmul.mubr.msk.f32.gmra.mxu0 %vm511_vm1, %v486_v12  ;;  %v1181_v57 = vld [vmem:[%s4074_s19 + $0xb0] sm:$0xff]  ;;  %v1182_v58 = vld [vmem:[%s4074_s19 + $0xb8] sm:$0xff]  ;;  %v1183_v59 = vld [vmem:[%s4074_s19 + $0xc0] sm:$0xff] }
  0x22   : > { %3374 = vmatmul.mubr.msk.f32.gmra.mxu1 %vm511_vm1, %v486_v12  ;;  %3326 = vmatprep.mubr.msk.f32.mxu0 %vm511_vm1, %v487_v13  ;;  %v1184_v60 = vld [vmem:[%s4074_s19 + $0xc8] sm:$0xff]  ;;  %v1185_v61 = vld [vmem:[%s4074_s19 + $0xd0] sm:$0xff]  ;;  %v1186_v62 = vld [vmem:[%s4074_s19 + $0xd8] sm:$0xff] }
  0x23   : > { %3376 = vmatprep.mubr.msk.f32.mxu1 %vm511_vm1, %v487_v13  ;;  %v1187_v63 = vld [vmem:[%s4074_s19 + $0xe0] sm:$0xff]  ;;  %v1188_v0 = vld [vmem:[%s4074_s19 + $0xe8] sm:$0xff]  ;;  %v1189_v1 = vld [vmem:[%s4074_s19 + $0xf0] sm:$0xff] }
  0x24   : > { %v1190_v2 = vld [vmem:[%s4074_s19 + $0xf8] sm:$0xff] }
  0x25   : > { %3327 = vmatmul.mubr.msk.f32.gmra.mxu0 %vm511_vm1, %v488_v14 }
  0x26   : > { %3377 = vmatmul.mubr.msk.f32.gmra.mxu1 %vm511_vm1, %v488_v14  ;;  %3329 = vmatprep.mubr.msk.f32.mxu0 %vm511_vm1, %v489_v15 }
  0x27   : > { %3379 = vmatprep.mubr.msk.f32.mxu1 %vm511_vm1, %v489_v15 }
  0x29   : > { %3330 = vmatmul.mubr.msk.f32.gmra.mxu0 %vm511_vm1, %v490_v16 }
  0x2a   : > { %3380 = vmatmul.mubr.msk.f32.gmra.mxu1 %vm511_vm1, %v490_v16  ;;  %3332 = vmatprep.mubr.msk.f32.mxu0 %vm511_vm1, %v491_v17 }
  0x2b   : > { %3382 = vmatprep.mubr.msk.f32.mxu1 %vm511_vm1, %v491_v17 }
  0x2d   : > { %3333 = vmatmul.mubr.msk.f32.gmra.mxu0 %vm511_vm1, %v492_v18 }
  0x2e   : > { %3383 = vmatmul.mubr.msk.f32.gmra.mxu1 %vm511_vm1, %v492_v18  ;;  %3335 = vmatprep.mubr.msk.f32.mxu0 %vm511_vm1, %v493_v19 }
  0x2f   : > { %3385 = vmatprep.mubr.msk.f32.mxu1 %vm511_vm1, %v493_v19 }
  0x31   : > { %3336 = vmatmul.mubr.msk.f32.gmra.mxu0 %vm511_vm1, %v494_v20 }
  0x32   : > { %3386 = vmatmul.mubr.msk.f32.gmra.mxu1 %vm511_vm1, %v494_v20  ;;  %3338 = vmatprep.mubr.msk.f32.mxu0 %vm511_vm1, %v495_v21 }
  0x33   : > { %3388 = vmatprep.mubr.msk.f32.mxu1 %vm511_vm1, %v495_v21 }
  0x35   : > { %3339 = vmatmul.mubr.msk.f32.gmra.mxu0 %vm511_vm1, %v496_v22 }
  0x36   : > { %3389 = vmatmul.mubr.msk.f32.gmra.mxu1 %vm511_vm1, %v496_v22  ;;  %3341 = vmatprep.mubr.msk.f32.mxu0 %vm511_vm1, %v497_v23 }
  0x37   : > { %3391 = vmatprep.mubr.msk.f32.mxu1 %vm511_vm1, %v497_v23 }
  0x39   : > { %3342 = vmatmul.mubr.msk.f32.gmra.mxu0 %vm511_vm1, %v498_v24 }
  0x3a   : > { %3392 = vmatmul.mubr.msk.f32.gmra.mxu1 %vm511_vm1, %v498_v24  ;;  %3344 = vmatprep.mubr.msk.f32.mxu0 %vm511_vm1, %v499_v25 }
  0x3b   : > { %3394 = vmatprep.mubr.msk.f32.mxu1 %vm511_vm1, %v499_v25 }
  0x3d   : > { %3345 = vmatmul.mubr.msk.f32.gmra.mxu0 %vm511_vm1, %v500_v26 }
  0x3e   : > { %3395 = vmatmul.mubr.msk.f32.gmra.mxu1 %vm511_vm1, %v500_v26  ;;  %3347 = vmatprep.mubr.msk.f32.mxu0 %vm511_vm1, %v501_v27 }
  0x3f   : > { %3397 = vmatprep.mubr.msk.f32.mxu1 %vm511_vm1, %v501_v27 }
  0x41   : > { %3348 = vmatmul.mubr.msk.f32.gmra.mxu0 %vm511_vm1, %v502_v28 }
  0x42   : > { %3398 = vmatmul.mubr.msk.f32.gmra.mxu1 %vm511_vm1, %v502_v28  ;;  %3350 = vmatprep.mubr.msk.f32.mxu0 %vm511_vm1, %v503_v29 }
  0x43   : > { %3400 = vmatprep.mubr.msk.f32.mxu1 %vm511_vm1, %v503_v29 }
  0x45   : > { %3351 = vmatmul.mubr.msk.f32.gmra.mxu0 %vm511_vm1, %v504_v30 }
  0x46   : > { %3401 = vmatmul.mubr.msk.f32.gmra.mxu1 %vm511_vm1, %v504_v30  ;;  %3353 = vmatprep.mubr.msk.f32.mxu0 %vm511_vm1, %v505_v31 }
  0x47   : > { %3403 = vmatprep.mubr.msk.f32.mxu1 %vm511_vm1, %v505_v31 }
  0x49   : > { %3354 = vmatmul.mubr.msk.f32.gmra.mxu0 %vm511_vm1, %v506_v32 }
  0x4a   : > { %3404 = vmatmul.mubr.msk.f32.gmra.mxu1 %vm511_vm1, %v506_v32  ;;  %3356 = vmatprep.mubr.msk.f32.mxu0 %vm511_vm1, %v507_v33 }
  0x4b   : > { %3406 = vmatprep.mubr.msk.f32.mxu1 %vm511_vm1, %v507_v33 }
  0x4d   : > { %3357 = vmatmul.mubr.msk.f32.gmra.mxu0 %vm511_vm1, %v508_v34 }
  0x4e   : > { %3407 = vmatmul.mubr.msk.f32.gmra.mxu1 %vm511_vm1, %v508_v34  ;;  %3411 = vmatprep.mubr.msk.f32.mxu0 %vm511_vm1, %v1159_v35 }
  0x51   : > { %3412 = vmatmul.mubr.msk.f32.vlgmr.msra.gmra.mxu0 %vm511_vm1, %v1160_v36 }
  0x52   : > { %3414 = vmatprep.mubr.msk.f32.mxu0 %vm511_vm1, %v1161_v37 }
  0x55   : > { %3415 = vmatmul.mubr.msk.f32.gmra.mxu0 %vm511_vm1, %v1162_v38 }
  0x56   : > { %3417 = vmatprep.mubr.msk.f32.mxu0 %vm511_vm1, %v1163_v39 }
  0x59   : > { %3418 = vmatmul.mubr.msk.f32.gmra.mxu0 %vm511_vm1, %v1164_v40 }
  0x5a   : > { %3420 = vmatprep.mubr.msk.f32.mxu0 %vm511_vm1, %v1165_v41 }
  0x5d   : > { %3421 = vmatmul.mubr.msk.f32.gmra.mxu0 %vm511_vm1, %v1166_v42 }
  0x5e   : > { %3423 = vmatprep.mubr.msk.f32.mxu0 %vm511_vm1, %v1167_v43 }
  0x61   : > { %3424 = vmatmul.mubr.msk.f32.gmra.mxu0 %vm511_vm1, %v1168_v44 }
  0x62   : > { %3426 = vmatprep.mubr.msk.f32.mxu0 %vm511_vm1, %v1169_v45 }
  0x65   : > { %3427 = vmatmul.mubr.msk.f32.gmra.mxu0 %vm511_vm1, %v1170_v46 }
  0x66   : > { %3429 = vmatprep.mubr.msk.f32.mxu0 %vm511_vm1, %v1171_v47 }
  0x69   : > { %3430 = vmatmul.mubr.msk.f32.gmra.mxu0 %vm511_vm1, %v1172_v48 }
  0x6a   : > { %3432 = vmatprep.mubr.msk.f32.mxu0 %vm511_vm1, %v1173_v49 }
  0x6d   : > { %3433 = vmatmul.mubr.msk.f32.gmra.mxu0 %vm511_vm1, %v1174_v50 }
  0x6e   : > { %3435 = vmatprep.mubr.msk.f32.mxu0 %vm511_vm1, %v1175_v51 }
  0x71   : > { %3436 = vmatmul.mubr.msk.f32.gmra.mxu0 %vm511_vm1, %v1176_v52 }
  0x72   : > { %3438 = vmatprep.mubr.msk.f32.mxu0 %vm511_vm1, %v1177_v53 }
  0x75   : > { %3439 = vmatmul.mubr.msk.f32.gmra.mxu0 %vm511_vm1, %v1178_v54 }
  0x76   : > { %3441 = vmatprep.mubr.msk.f32.mxu0 %vm511_vm1, %v1179_v55 }
  0x79   : > { %3442 = vmatmul.mubr.msk.f32.gmra.mxu0 %vm511_vm1, %v1180_v56 }
  0x7a   : > { %3444 = vmatprep.mubr.msk.f32.mxu0 %vm511_vm1, %v1181_v57 }
  0x7d   : > { %3445 = vmatmul.mubr.msk.f32.gmra.mxu0 %vm511_vm1, %v1182_v58 }
  0x7e   : > { %3447 = vmatprep.mubr.msk.f32.mxu0 %vm511_vm1, %v1183_v59 }
  0x81   : > { %3448 = vmatmul.mubr.msk.f32.gmra.mxu0 %vm511_vm1, %v1184_v60 }
  0x82   : > { %3450 = vmatprep.mubr.msk.f32.mxu0 %vm511_vm1, %v1185_v61 }
  0x85   : > { %3451 = vmatmul.mubr.msk.f32.gmra.mxu0 %vm511_vm1, %v1186_v62 }
  0x86   : > { %3453 = vmatprep.mubr.msk.f32.mxu0 %vm511_vm1, %v1187_v63  ;;  %v4228_v63 = vld [vmem:[%s4998_s5] ss:$0 sm:$0xff] }
  0x89   : > { %3454 = vmatmul.mubr.msk.f32.gmra.mxu0 %vm511_vm1, %v1188_v0 }
  0x8a   : > { %3456 = vmatprep.mubr.msk.f32.mxu0 %vm511_vm1, %v1189_v1  ;;  %v4235_v1 = vld [vmem:[%s4996_s3] ss:$0 sm:$0xff] }
  0x8d   : > { %3457 = vmatmul.mubr.msk.f32.gmra.mxu0 %vm511_vm1, %v1190_v2 }
  0xd1   : > { %v4147_v3 = vpop.f32.mrf.mxu0 }
  0xd2   : > { %v4171_v18 = vpop.f32.mrf.mxu1 }
  0xd3   : > { %v4149_v4 = vpop.f32.mrf.mxu0 }
  0xd4   : > { %v4175_v20 = vpop.f32.mrf.mxu1 }
  0xd5   : > { %v4151_v5 = vpop.f32.mrf.mxu0 }
  0xd6   : > { %v4177_v22 = vpop.f32.mrf.mxu1 }
  0xd7   : > { %v4153_v6 = vpop.f32.mrf.mxu0 }
  0xd8   : > { %v4179_v24 = vpop.f32.mrf.mxu1 }
  0xd9   : > { %v4155_v7 = vpop.f32.mrf.mxu0 }
  0xda   : > { %v4183_v26 = vpop.f32.mrf.mxu1 }
  0xdb   : > { %v4157_v8 = vpop.f32.mrf.mxu0 }
  0xdc   : > { %v4187_v28 = vpop.f32.mrf.mxu1 }
  0xdd   : > { %v3322_v9 = vpop.f32.mrf.mxu0 }
  0xde   : > { %v4191_v30 = vpop.f32.mrf.mxu1 }
  0xdf   : > { %v708_v10 = vpop.f32.mrf.mxu0 }
  0xe0   : > { %v4195_v32 = vpop.f32.mrf.mxu1 }
  0xe1   : > { %v4159_v11 = vpop.f32.mrf.mxu0 }
  0xe2   : > { %v838_v12 = vmax.f32 %v4147_v3, %v4159_v11  ;;  %v4197_v34 = vpop.f32.mrf.mxu1 }
  0xe3   : > { %v4163_v13 = vpop.f32.mrf.mxu0 }
  0xe4   : > { %v837_v14 = vmax.f32 %v4149_v4, %v4163_v13  ;;  %v4199_v36 = vpop.f32.mrf.mxu1 }
  0xe5   : > { %v4167_v15 = vpop.f32.mrf.mxu0 }
  0xe6   : > { %v4201_v38 = vpop.f32.mrf.mxu1 }
  0xe7   : > { %v4169_v16 = vpop.f32.mrf.mxu0 }
  0xe8   : > { %v4203_v40 = vpop.f32.mrf.mxu1 }
  0xe9   : > { %v3331_v17 = vpop.f32.mrf.mxu0  ;;  %v1115_v13 = vmax.f32 %v4179_v24, %v4203_v40 }
  0xea   : > { %v4207_v42 = vpop.f32.mrf.mxu1 }
  0xeb   : > { %v4173_v19 = vpop.f32.mrf.mxu0 }
  0xec   : > { %v4211_v44 = vpop.f32.mrf.mxu1 }
  0xed   : > { %v3334_v21 = vpop.f32.mrf.mxu0  ;;  %v1117_v11 = vmax.f32 %v4187_v28, %v4211_v44  ;;  %v3007_v28 = vld [vmem:[%s5000_s7] ss:$0 sm:$0xff] }
  0xee   : > { %v4213_v46 = vpop.f32.mrf.mxu1  ;;  %v844_v55 = vmax.f32 %v3322_v9, %v3334_v21  ;;  %v842_v9 = vmax.f32 %v4155_v7, %v3331_v17  ;;  %v841_v7 = vmax.f32 %v4157_v8, %v4173_v19 }
  0xef   : > { %v748_v23 = vpop.f32.mrf.mxu0 }
  0xf0   : > { %v4215_v48 = vpop.f32.mrf.mxu1  ;;  %v843_v59 = vmax.f32 %v708_v10, %v748_v23 }
  0xf1   : > { %v4181_v25 = vpop.f32.mrf.mxu0 }
  0xf2   : > { %v4217_v50 = vpop.f32.mrf.mxu1 }
  0xf3   : > { %v4185_v27 = vpop.f32.mrf.mxu0 }
  0xf4   : > { %v4219_v52 = vpop.f32.mrf.mxu1 }
  0xf5   : > { %v4189_v29 = vpop.f32.mrf.mxu0 }
  0xf6   : > { %v4221_v54 = vpop.f32.mrf.mxu1 }
  0xf7   : > { %v4193_v31 = vpop.f32.mrf.mxu0 }
  0xf8   : > { %v4223_v58 = vpop.f32.mrf.mxu1 }
  0xf9   : > { %v3343_v33 = vpop.f32.mrf.mxu0 }
  0xfa   : > { %v4237_v2 = vpop.f32.mrf.mxu1 }
  0xfb   : > { %v778_v35 = vpop.f32.mrf.mxu0 }
  0xfd   : > { %v3346_v37 = vpop.f32.mrf.mxu0 }
  0xff   : > { %v788_v39 = vpop.f32.mrf.mxu0 }
 0x101   : > { %v4205_v41 = vpop.f32.mrf.mxu0 }
 0x103   : > { %v4209_v43 = vpop.f32.mrf.mxu0 }
 0x105   : > { %v3352_v45 = vpop.f32.mrf.mxu0 }
 0x107   : > { %v808_v47 = vpop.f32.mrf.mxu0 }
 0x109   : > { %v3355_v49 = vpop.f32.mrf.mxu0 }
 0x10a   : > { %v850_v60 = vmax.f32 %v3343_v33, %v3355_v49  ;;  %v4241_v33 = vpop.f32.mrf.mxu1 }
 0x10b   : > { %v818_v51 = vpop.f32.mrf.mxu0 }
 0x10d   : > { %v3358_v53 = vpop.f32.mrf.mxu0 }
 0x10e   : > { %v852_v56 = vmax.f32 %v3346_v37, %v3358_v53  ;;  %v858_v37 = vmax.f32 %v842_v9, %v850_v60 }
 0x10f   : > { %v828_v57 = vpop.f32.mrf.mxu0 }
 0x110   : > { %v860_v61 = vmax.f32 %v844_v55, %v852_v56  ;;  %v851_v62 = vmax.f32 %v788_v39, %v828_v57  ;;  %v849_v39 = vmax.f32 %v778_v35, %v818_v51  ;;  %v3396_v56 = vpop.f32.mrf.mxu1  ;;  %v872_v51 = vadd.f32 %v4228_v63, %v858_v37 }
 0x111   : > { %v4230_v0 = vpop.f32.mrf.mxu0 }
 0x112   : > { %v859_v10 = vmax.f32 %v843_v59, %v851_v62  ;;  %v874_v21 = vadd.f32 %v4228_v63, %v860_v61  ;;  %v1064_v57 = vpop.f32.mrf.mxu1  ;;  %v848_v59 = vmax.f32 %v4189_v29, %v3352_v45  ;;  %v857_v35 = vmax.f32 %v841_v7, %v849_v39 }
 0x113   : > { %v1366_v23 = vpop.f32.mrf.mxu0  ;;  %v840_v62 = vmax.f32 %v4151_v5, %v4167_v15  ;;  %v846_v5 = vmax.f32 %v4181_v25, %v4205_v41  ;;  %v1118_v7 = vmax.f32 %v4183_v26, %v4207_v42 }
 0x114   : > { %3459 = vmatprep.subr.mxu1 %v874_v21  ;;  %v873_v49 = vadd.f32 %v4228_v63, %v859_v10  ;;  %v1367_v53 = vadd.f32 %v4235_v1, %v1366_v23  ;;  %v4255_v61 = vpop.f32.mrf.mxu1  ;;  %v847_v10 = vmax.f32 %v4193_v31, %v808_v47  ;;  %v871_v29 = vadd.f32 %v4228_v63, %v857_v35 }
 0x115   : > { %3460 = vmatpush3.xpose.msra.mxu1 %v874_v21  ;;  %v4245_v55 = vpop.f32.mrf.mxu0  ;;  %v856_v9 = vmax.f32 %v840_v62, %v848_v59  ;;  %v839_v23 = vmax.f32 %v4153_v6, %v4169_v16  ;;  %v845_v6 = vmax.f32 %v4185_v27, %v4209_v43  ;;  %v1120_v59 = vmax.f32 %v4191_v30, %v4213_v46 }
 0x116   : > { %3461 = vmatprep.subr.mxu1 %v873_v49  ;;  %3475 = vmatprep.mubr.f32.mxu1 %v1367_v53  ;;  %v4261_v19 = vpop.f32.mrf.mxu1  ;;  %v854_v53 = vmax.f32 %v838_v12, %v846_v5  ;;  %v1119_v12 = vmax.f32 %v4195_v32, %v4215_v48  ;;  %v1116_v46 = vmax.f32 %v4177_v22, %v4201_v38 }
 0x117   : > { %v4249_v17 = vpop.f32.mrf.mxu0  ;;  %v855_v39 = vmax.f32 %v839_v23, %v847_v10  ;;  %v853_v26 = vmax.f32 %v837_v14, %v845_v6 }
 0x118   : > { %v3402_v21 = vpop.f32.mrf.mxu1  ;;  %v868_v30 = vadd.f32 %v4228_v63, %v854_v53  ;;  %v1377_v23 = vadd.f32 %v4235_v1, %v4249_v17  ;;  %v1382_v17 = vadd.f32 %v4245_v55, %v4235_v1 }
 0x119   : > { %3462 = vmatpush3.xpose.msra.mxu1 %v873_v49  ;;  %v4253_v60 = vpop.f32.mrf.mxu0  ;;  %v870_v49 = vadd.f32 %v4228_v63, %v856_v9  ;;  %v869_v41 = vadd.f32 %v4228_v63, %v855_v39  ;;  %v1124_v32 = vmax.f32 %v4221_v54, %v3402_v21  ;;  %v867_v62 = vadd.f32 %v4228_v63, %v853_v26 }
 0x11a   : > { %3463 = vmatprep.subr.mxu1 %v872_v51  ;;  %v1084_v37 = vpop.f32.mrf.mxu1  ;;  %v1114_v54 = vmax.f32 %v4171_v18, %v4197_v34  ;;  %v1121_v63 = vmax.f32 %v4219_v52, %v4261_v19  ;;  %v1392_v53 = vadd.f32 %v4253_v60, %v4235_v1 }
 0x11b   : > { %v4259_v8 = vpop.f32.mrf.mxu0  ;;  %v1123_v14 = vmax.f32 %v4223_v58, %v1084_v37  ;;  %v1132_v10 = vmax.f32 %v1116_v46, %v1124_v32  ;;  %v1113_v58 = vmax.f32 %v4175_v20, %v4199_v36  ;;  %v1372_v20 = vadd.f32 %v4230_v0, %v4235_v1 }
 0x11c   : > { %v3405_v47 = vpop.f32.mrf.mxu1  ;;  %v1387_v39 = vadd.f32 %v4235_v1, %v4259_v8 }
 0x11d   : > { %3464 = vmatpush3.xpose.msra.mxu1 %v872_v51  ;;  %v4265_v45 = vpop.f32.mrf.mxu0  ;;  %v1126_v35 = vmax.f32 %v4237_v2, %v3405_v47  ;;  %v1131_v21 = vmax.f32 %v1115_v13, %v1123_v14  ;;  %v1129_v36 = vmax.f32 %v1113_v58, %v1121_v63 }
 0x11e   : > { %3465 = vmatprep.subr.mxu1 %v871_v29  ;;  %v1094_v25 = vpop.f32.mrf.mxu1  ;;  %v1402_v55 = vadd.f32 %v4265_v45, %v4235_v1 }
 0x11f   : > { %v4271_v15 = vpop.f32.mrf.mxu0  ;;  %v1125_v27 = vmax.f32 %v4241_v33, %v1094_v25  ;;  %v1134_v44 = vmax.f32 %v1118_v7, %v1126_v35  ;;  %v1145_v52 = vadd.f32 %v3007_v28, %v1131_v21  ;;  %v1143_v47 = vadd.f32 %v3007_v28, %v1129_v36 }
 0x120   : > { %v3408_v3 = vpop.f32.mrf.mxu1  ;;  %v1397_v6 = vadd.f32 %v4235_v1, %v4271_v15 }
 0x121   : > { %3466 = vmatpush3.xpose.msra.mxu1 %v871_v29  ;;  %v4274_v31 = vpop.f32.mrf.mxu0  ;;  %v1128_v43 = vmax.f32 %v3396_v56, %v3408_v3  ;;  %v1133_v22 = vmax.f32 %v1117_v11, %v1125_v27  ;;  %v1148_v24 = vadd.f32 %v3007_v28, %v1134_v44 }
 0x122   : > { %3467 = vmatprep.subr.mxu1 %v870_v49  ;;  %v1104_v2 = vpop.f32.mrf.mxu1  ;;  %v1412_v60 = vadd.f32 %v4274_v31, %v4235_v1 }
 0x123   : > { %v4281_v16 = vpop.f32.mrf.mxu0  ;;  %v1136_v48 = vmax.f32 %v1120_v59, %v1128_v43  ;;  %v1127_v33 = vmax.f32 %v1064_v57, %v1104_v2  ;;  %v1122_v57 = vmax.f32 %v4217_v50, %v4255_v61  ;;  %v1147_v18 = vadd.f32 %v3007_v28, %v1133_v22 }
 0x124   : > { %v1146_v61 = vadd.f32 %v3007_v28, %v1132_v10  ;;  %v1407_v25 = vadd.f32 %v4235_v1, %v4281_v16 }
 0x125   : > { %3468 = vmatpush3.xpose.msra.mxu1 %v870_v49  ;;  %v4289_v51 = vpop.f32.mrf.mxu0  ;;  %v1135_v38 = vmax.f32 %v1119_v12, %v1127_v33  ;;  %v1150_v56 = vadd.f32 %v3007_v28, %v1136_v48  ;;  %v1130_v50 = vmax.f32 %v1114_v54, %v1122_v57 }
 0x126   : > { %3469 = vmatprep.subr.mxu1 %v869_v41  ;;  %v1422_v59 = vadd.f32 %v4289_v51, %v4235_v1 }
 0x127   : > { %v4300_v42 = vpop.f32.mrf.mxu0  ;;  %3523 = vmatprep.subr.mxu0 %v1150_v56  ;;  %v1149_v29 = vadd.f32 %v3007_v28, %v1135_v38  ;;  %v1144_v37 = vadd.f32 %v3007_v28, %v1130_v50 }
 0x128   : > { %3524 = vmatpush3.msra.mxu0 %v1150_v56  ;;  %v1417_v15 = vadd.f32 %v4235_v1, %v4300_v42 }
 0x129   : > { %3470 = vmatpush3.xpose.msra.mxu1 %v869_v41  ;;  %v4308_v4 = vpop.f32.mrf.mxu0  ;;  %3525 = vmatprep.subr.mxu0 %v1149_v29 }
 0x12a   : > { %3471 = vmatprep.subr.mxu1 %v868_v30  ;;  %3526 = vmatpush3.msra.mxu0 %v1149_v29  ;;  %v1432_v16 = vadd.f32 %v4308_v4, %v4235_v1 }
 0x12b   : > { %v4314_v9 = vpop.f32.mrf.mxu0  ;;  %3527 = vmatprep.subr.mxu0 %v1148_v24 }
 0x12c   : > { %3528 = vmatpush3.msra.mxu0 %v1148_v24  ;;  %v1427_v45 = vadd.f32 %v4235_v1, %v4314_v9 }
 0x12d   : > { %3472 = vmatpush3.xpose.msra.mxu1 %v868_v30  ;;  %v4320_v40 = vpop.f32.mrf.mxu0  ;;  %3529 = vmatprep.subr.mxu0 %v1147_v18 }
 0x12e   : > { %3473 = vmatprep.subr.mxu1 %v867_v62  ;;  %3530 = vmatpush3.msra.mxu0 %v1147_v18  ;;  %v1442_v11 = vadd.f32 %v4320_v40, %v4235_v1 }
 0x12f   : > { %v1436_v34 = vpop.f32.mrf.mxu0  ;;  %3531 = vmatprep.subr.mxu0 %v1146_v61 }
 0x130   : > { %3532 = vmatpush3.msra.mxu0 %v1146_v61  ;;  %v1437_v31 = vadd.f32 %v4235_v1, %v1436_v34 }
 0x131   : > { %3474 = vmatpush3.xpose.msra.mxu1 %v867_v62  ;;  %v3437_v5 = vpop.f32.mrf.mxu0  ;;  %3533 = vmatprep.subr.mxu0 %v1145_v52 }
 0x132   : > { %3534 = vmatpush3.msra.mxu0 %v1145_v52  ;;  %v1452_v27 = vadd.f32 %v3437_v5, %v4235_v1 }
 0x133   : > { %v1446_v19 = vpop.f32.mrf.mxu0  ;;  %3535 = vmatprep.subr.mxu0 %v1144_v37 }
 0x134   : > { %3476 = vmatmul.mubr.f32.vlgmr.msra.gmra.mxu1 %v1372_v20  ;;  %3536 = vmatpush3.msra.mxu0 %v1144_v37  ;;  %v1447_v51 = vadd.f32 %v4235_v1, %v1446_v19 }
 0x135   : > { %3478 = vmatprep.mubr.f32.mxu1 %v1377_v23  ;;  %v3440_v49 = vpop.f32.mrf.mxu0  ;;  %3537 = vmatprep.subr.mxu0 %v1143_v47 }
 0x136   : > { %3538 = vmatpush3.msra.mxu0 %v1143_v47  ;;  %v1462_v30 = vadd.f32 %v3440_v49, %v4235_v1 }
 0x137   : > { %v1456_v0 = vpop.f32.mrf.mxu0 }
 0x138   : > { %3479 = vmatmul.mubr.f32.gmra.mxu1 %v1382_v17  ;;  %v1457_v43 = vadd.f32 %v4235_v1, %v1456_v0 }
 0x139   : > { %3481 = vmatprep.mubr.f32.mxu1 %v1387_v39  ;;  %v3443_v8 = vpop.f32.mrf.mxu0 }
 0x13a   : > { %v1472_v2 = vadd.f32 %v3443_v8, %v4235_v1 }
 0x13b   : > { %v1466_v41 = vpop.f32.mrf.mxu0 }
 0x13c   : > { %3482 = vmatmul.mubr.f32.gmra.mxu1 %v1392_v53  ;;  %v1467_v42 = vadd.f32 %v4235_v1, %v1466_v41 }
 0x13d   : > { %3484 = vmatprep.mubr.f32.mxu1 %v1397_v6  ;;  %v3446_v7 = vpop.f32.mrf.mxu0 }
 0x13e   : > { %v1482_v44 = vadd.f32 %v3446_v7, %v4235_v1 }
 0x13f   : > { %v1476_v35 = vpop.f32.mrf.mxu0 }
 0x140   : > { %3485 = vmatmul.mubr.f32.gmra.mxu1 %v1402_v55  ;;  %v1477_v28 = vadd.f32 %v4235_v1, %v1476_v35 }
 0x141   : > { %3487 = vmatprep.mubr.f32.mxu1 %v1407_v25  ;;  %v3449_v3 = vpop.f32.mrf.mxu0 }
 0x142   : > { %v1492_v4 = vadd.f32 %v3449_v3, %v4235_v1 }
 0x143   : > { %v1486_v12 = vpop.f32.mrf.mxu0 }
 0x144   : > { %3488 = vmatmul.mubr.f32.gmra.mxu1 %v1412_v60  ;;  %v1487_v48 = vadd.f32 %v4235_v1, %v1486_v12 }
 0x145   : > { %3490 = vmatprep.mubr.f32.mxu1 %v1417_v15  ;;  %v3452_v26 = vpop.f32.mrf.mxu0 }
 0x146   : > { %v1502_v22 = vadd.f32 %v3452_v26, %v4235_v1 }
 0x147   : > { %v1496_v46 = vpop.f32.mrf.mxu0 }
 0x148   : > { %3491 = vmatmul.mubr.f32.gmra.mxu1 %v1422_v59  ;;  %v1497_v13 = vadd.f32 %v4235_v1, %v1496_v46 }
 0x149   : > { %3493 = vmatprep.mubr.f32.mxu1 %v1427_v45  ;;  %v3455_v32 = vpop.f32.mrf.mxu0 }
 0x14a   : > { %v1512_v62 = vadd.f32 %v3455_v32, %v4235_v1 }
 0x14b   : > { %v1506_v33 = vpop.f32.mrf.mxu0 }
 0x14c   : > { %3494 = vmatmul.mubr.f32.gmra.mxu1 %v1432_v16  ;;  %v1507_v38 = vadd.f32 %v4235_v1, %v1506_v33 }
 0x14d   : > { %3496 = vmatprep.mubr.f32.mxu1 %v1437_v31  ;;  %v3458_v14 = vpop.f32.mrf.mxu0 }
 0x14e   : > { %v1522_v54 = vadd.f32 %v3458_v14, %v4235_v1 }
 0x14f   : > { %v1516_v56 = vpop.f32.mrf.mxu0 }
 0x150   : > { %3497 = vmatmul.mubr.f32.gmra.mxu1 %v1442_v11  ;;  %v1517_v9 = vadd.f32 %v4235_v1, %v1516_v56 }
 0x151   : > { %3499 = vmatprep.mubr.f32.mxu1 %v1447_v51 }
 0x154   : > { %3500 = vmatmul.mubr.f32.gmra.mxu1 %v1452_v27 }
 0x155   : > { %3502 = vmatprep.mubr.f32.mxu1 %v1457_v43 }
 0x158   : > { %3503 = vmatmul.mubr.f32.gmra.mxu1 %v1462_v30 }
 0x159   : > { %3505 = vmatprep.mubr.f32.mxu1 %v1467_v42 }
 0x15c   : > { %3506 = vmatmul.mubr.f32.gmra.mxu1 %v1472_v2 }
 0x15d   : > { %3508 = vmatprep.mubr.f32.mxu1 %v1477_v28 }
 0x160   : > { %3509 = vmatmul.mubr.f32.gmra.mxu1 %v1482_v44 }
 0x161   : > { %3511 = vmatprep.mubr.f32.mxu1 %v1487_v48 }
 0x164   : > { %3512 = vmatmul.mubr.f32.gmra.mxu1 %v1492_v4 }
 0x165   : > { %3514 = vmatprep.mubr.f32.mxu1 %v1497_v13 }
 0x168   : > { %3515 = vmatmul.mubr.f32.gmra.mxu1 %v1502_v22 }
 0x169   : > { %3517 = vmatprep.mubr.f32.mxu1 %v1507_v38 }
 0x16c   : > { %3518 = vmatmul.mubr.f32.gmra.mxu1 %v1512_v62 }
 0x16d   : > { %3520 = vmatprep.mubr.f32.mxu1 %v1517_v9 }
 0x170   : > { %3521 = vmatmul.mubr.f32.gmra.mxu1 %v1522_v54 }
 0x1f4   : > { %v4371_v57 = vpop.f32.mrf.mxu1 }
 0x1f5   : > { %v1762_v58 = vsel %vm1758_vm2, %v4371_v57, -inf }
 0x1f6   : > { %v4373_v10 = vpop.f32.mrf.mxu1 }
 0x1f7   : > { %v1759_v29 = vsel %vm1758_vm2, %v4373_v10, -inf }
 0x1f8   : > { %1760 = vmax.xlane.f32.xlu0 %v1759_v29  ;;  %v4377_v24 = vpop.f32.mrf.mxu1 }
 0x1f9   : > { %v1768_v18 = vsel %vm1758_vm2, %v4377_v24, -inf }
 0x1fa   : > { %v4379_v40 = vpop.f32.mrf.mxu1 }
 0x1fb   : > { %v1765_v1 = vsel %vm1758_vm2, %v4379_v40, -inf }
 0x1fc   : > { %1763 = vmax.xlane.f32.xlu0 %v1762_v58  ;;  %1766 = vmax.xlane.f32.xlu1 %v1765_v1  ;;  %v4385_v63 = vpop.f32.mrf.mxu1 }
 0x1fd   : > { %v1774_v23 = vsel %vm1758_vm2, %v4385_v63, -inf }
 0x1fe   : > { %v4387_v21 = vpop.f32.mrf.mxu1 }
 0x1ff   : > { %v1771_v34 = vsel %vm1758_vm2, %v4387_v21, -inf }
 0x200   : > { %1769 = vmax.xlane.f32.xlu1 %v1768_v18  ;;  %1772 = vmax.xlane.f32.xlu0 %v1771_v34  ;;  %v4393_v50 = vpop.f32.mrf.mxu1 }
 0x201   : > { %v1780_v52 = vsel %vm1758_vm2, %v4393_v50, -inf }
 0x202   : > { %v4395_v61 = vpop.f32.mrf.mxu1 }
 0x203   : > { %v1777_v5 = vsel %vm1758_vm2, %v4395_v61, -inf }
 0x204   : > { %1775 = vmax.xlane.f32.xlu1 %v1774_v23  ;;  %1778 = vmax.xlane.f32.xlu0 %v1777_v5  ;;  %v4401_v20 = vpop.f32.mrf.mxu1 }
 0x205   : > { %v1786_v49 = vsel %vm1758_vm2, %v4401_v20, -inf }
 0x206   : > { %v4403_v36 = vpop.f32.mrf.mxu1 }
 0x207   : > { %v1783_v19 = vsel %vm1758_vm2, %v4403_v36, -inf }
 0x208   : > { %1781 = vmax.xlane.f32.xlu1 %v1780_v52  ;;  %1784 = vmax.xlane.f32.xlu0 %v1783_v19  ;;  %v4409_v37 = vpop.f32.mrf.mxu1 }
 0x209   : > { %v1792_v53 = vsel %vm1758_vm2, %v4409_v37, -inf }
 0x20a   : > { %v4411_v39 = vpop.f32.mrf.mxu1 }
 0x20b   : > { %v1789_v17 = vsel %vm1758_vm2, %v4411_v39, -inf }
 0x20c   : > { %1787 = vmax.xlane.f32.xlu1 %v1786_v49  ;;  %1790 = vmax.xlane.f32.xlu0 %v1789_v17  ;;  %v4417_v47 = vpop.f32.mrf.mxu1 }
 0x20d   : > { %v1798_v25 = vsel %vm1758_vm2, %v4417_v47, -inf }
 0x20e   : > { %v4419_v0 = vpop.f32.mrf.mxu1 }
 0x20f   : > { %v1795_v6 = vsel %vm1758_vm2, %v4419_v0, -inf }
 0x210   : > { %1793 = vmax.xlane.f32.xlu1 %v1792_v53  ;;  %1796 = vmax.xlane.f32.xlu0 %v1795_v6  ;;  %v4425_v8 = vpop.f32.mrf.mxu1 }
 0x211   : > { %v1804_v7 = vsel %vm1758_vm2, %v4425_v8, -inf }
 0x212   : > { %v4427_v55 = vpop.f32.mrf.mxu1 }
 0x213   : > { %v1801_v41 = vsel %vm1758_vm2, %v4427_v55, -inf }
 0x214   : > { %1799 = vmax.xlane.f32.xlu1 %v1798_v25  ;;  %1802 = vmax.xlane.f32.xlu0 %v1801_v41  ;;  %v4433_v60 = vpop.f32.mrf.mxu1 }
 0x215   : > { %v1810_v16 = vsel %vm1758_vm2, %v4433_v60, -inf }
 0x216   : > { %v4435_v15 = vpop.f32.mrf.mxu1 }
 0x217   : > { %v1807_v59 = vsel %vm1758_vm2, %v4435_v15, -inf }
 0x218   : > { %1805 = vmax.xlane.f32.xlu1 %v1804_v7  ;;  %1808 = vmax.xlane.f32.xlu0 %v1807_v59  ;;  %v4441_v45 = vpop.f32.mrf.mxu1 }
 0x219   : > { %v1816_v51 = vsel %vm1758_vm2, %v4441_v45, -inf }
 0x21a   : > { %v4443_v35 = vpop.f32.mrf.mxu1 }
 0x21b   : > { %v1813_v31 = vsel %vm1758_vm2, %v4443_v35, -inf }
 0x21c   : > { %1811 = vmax.xlane.f32.xlu1 %v1810_v16  ;;  %1814 = vmax.xlane.f32.xlu0 %v1813_v31  ;;  %v4449_v3 = vpop.f32.mrf.mxu1 }
 0x21d   : > { %v1822_v26 = vsel %vm1758_vm2, %v4449_v3, -inf }
 0x21e   : > { %v4451_v11 = vpop.f32.mrf.mxu1 }
 0x21f   : > { %v1819_v12 = vsel %vm1758_vm2, %v4451_v11, -inf }
 0x220   : > { %1817 = vmax.xlane.f32.xlu1 %v1816_v51  ;;  %1820 = vmax.xlane.f32.xlu0 %v1819_v12  ;;  %v4457_v27 = vpop.f32.mrf.mxu1 }
 0x221   : > { %v1828_v2 = vsel %vm1758_vm2, %v4457_v27, -inf }
 0x222   : > { %v4459_v43 = vpop.f32.mrf.mxu1 }
 0x223   : > { %v1825_v30 = vsel %vm1758_vm2, %v4459_v43, -inf }
 0x224   : > { %1823 = vmax.xlane.f32.xlu1 %v1822_v26  ;;  %1826 = vmax.xlane.f32.xlu0 %v1825_v30  ;;  %v4465_v42 = vpop.f32.mrf.mxu1 }
 0x225   : > { %v1834_v48 = vsel %vm1758_vm2, %v4465_v42, -inf }
 0x226   : > { %v4467_v46 = vpop.f32.mrf.mxu1 }
 0x227   : > { %v1831_v28 = vsel %vm1758_vm2, %v4467_v46, -inf }
 0x228   : > { %1829 = vmax.xlane.f32.xlu1 %v1828_v2  ;;  %1832 = vmax.xlane.f32.xlu0 %v1831_v28  ;;  %v4473_v32 = vpop.f32.mrf.mxu1 }
 0x229   : > { %v1840_v14 = vsel %vm1758_vm2, %v4473_v32, -inf }
 0x22a   : > { %v4475_v44 = vpop.f32.mrf.mxu1 }
 0x22b   : > { %v1837_v33 = vsel %vm1758_vm2, %v4475_v44, -inf }
 0x22c   : > { %1835 = vmax.xlane.f32.xlu1 %v1834_v48  ;;  %1838 = vmax.xlane.f32.xlu0 %v1837_v33  ;;  %v4481_v4 = vpop.f32.mrf.mxu1 }
 0x22d   : > { %v1846_v62 = vsel %vm1758_vm2, %v4481_v4, -inf }
 0x22e   : > { %v4483_v13 = vpop.f32.mrf.mxu1 }
 0x22f   : > { %v1843_v22 = vsel %vm1758_vm2, %v4483_v13, -inf }
 0x230   : > { %1841 = vmax.xlane.f32.xlu1 %v1840_v14  ;;  %1844 = vmax.xlane.f32.xlu0 %v1843_v22  ;;  %v4489_v38 = vpop.f32.mrf.mxu1 }
 0x231   : > { %v1852_v54 = vsel %vm1758_vm2, %v4489_v38, -inf }
 0x232   : > { %v4491_v56 = vpop.f32.mrf.mxu1 }
 0x233   : > { %v1849_v9 = vsel %vm1758_vm2, %v4491_v56, -inf }
 0x234   : > { %1847 = vmax.xlane.f32.xlu1 %v1846_v62  ;;  %1850 = vmax.xlane.f32.xlu0 %v1849_v9 }
 0x238   : > { %1853 = vmax.xlane.f32.xlu1 %v1852_v54 }
 0x281   : > { %v1761_v29 = vpop.xlane.xlu0 %1760 }
 0x282   : > { %v1855_v58 = vsub.f32 %v4373_v10, %v1761_v29 }
 0x284   : > { %v1887_v1 = vmul.f32 1.442695, %v1855_v58 }
 0x285   : > { %v1764_v18 = vpop.xlane.xlu0 %1763  ;;  %v1767_v34 = vpop.xlane.xlu1 %1766 }
 0x286   : > { %3691 = vpow2.f32 %v1887_v1  ;;  %v1856_v23 = vsub.f32 %v4371_v57, %v1764_v18  ;;  %v1857_v5 = vsub.f32 %v4379_v40, %v1767_v34 }
 0x288   : > { %v1889_v52 = vmul.f32 1.442695, %v1856_v23  ;;  %v1891_v19 = vmul.f32 1.442695, %v1857_v5 }
 0x289   : > { %v1770_v49 = vpop.xlane.xlu1 %1769  ;;  %v1773_v17 = vpop.xlane.xlu0 %1772 }
 0x28a   : > { %3693 = vpow2.f32 %v1889_v52  ;;  %v1858_v53 = vsub.f32 %v4377_v24, %v1770_v49  ;;  %v1859_v6 = vsub.f32 %v4387_v21, %v1773_v17 }
 0x28b   : > { %3695 = vpow2.f32 %v1891_v19 }
 0x28c   : > { %v1893_v25 = vmul.f32 1.442695, %v1858_v53  ;;  %v1895_v10 = vmul.f32 1.442695, %v1859_v6 }
 0x28d   : > { %v1776_v41 = vpop.xlane.xlu1 %1775  ;;  %v1779_v7 = vpop.xlane.xlu0 %1778 }
 0x28e   : > { %3697 = vpow2.f32 %v1893_v25  ;;  %v1860_v59 = vsub.f32 %v4385_v63, %v1776_v41  ;;  %v1861_v57 = vsub.f32 %v4395_v61, %v1779_v7 }
 0x28f   : > { %3699 = vpow2.f32 %v1895_v10 }
 0x290   : > { %v1897_v40 = vmul.f32 1.442695, %v1860_v59  ;;  %v1899_v16 = vmul.f32 1.442695, %v1861_v57 }
 0x291   : > { %v1782_v31 = vpop.xlane.xlu1 %1781  ;;  %v1785_v51 = vpop.xlane.xlu0 %1784 }
 0x292   : > { %3701 = vpow2.f32 %v1897_v40  ;;  %v1862_v24 = vsub.f32 %v4393_v50, %v1782_v31  ;;  %v1863_v21 = vsub.f32 %v4403_v36, %v1785_v51 }
 0x293   : > { %v4508_v12 = vpop.eup %3691  ;;  %3703 = vpow2.f32 %v1899_v16 }
 0x294   : > { %v1901_v26 = vmul.f32 1.442695, %v1862_v24  ;;  %v1903_v30 = vmul.f32 1.442695, %v1863_v21  ;;  %v1951_v63 = vsel %vm1758_vm2, %v4508_v12, 0.0 }
 0x295   : > { %v1788_v2 = vpop.xlane.xlu1 %1787  ;;  %v1791_v61 = vpop.xlane.xlu0 %1790  ;;  %1952 = vadd.xlane.f32.xlu0 %v1951_v63 }
 0x296   : > { %3705 = vpow2.f32 %v1901_v26  ;;  %v1864_v28 = vsub.f32 %v4401_v20, %v1788_v2  ;;  %v1865_v48 = vsub.f32 %v4411_v39, %v1791_v61 }
 0x297   : > { %v4514_v33 = vpop.eup %3693  ;;  %3707 = vpow2.f32 %v1903_v30 }
 0x298   : > { %v4516_v50 = vpop.eup %3695  ;;  %v1905_v36 = vmul.f32 1.442695, %v1864_v28  ;;  %v1907_v14 = vmul.f32 1.442695, %v1865_v48  ;;  %v1954_v22 = vsel %vm1758_vm2, %v4514_v33, 0.0 }
 0x299   : > { %v1794_v62 = vpop.xlane.xlu1 %1793  ;;  %v1797_v9 = vpop.xlane.xlu0 %1796  ;;  %1955 = vadd.xlane.f32.xlu1 %v1954_v22  ;;  %v1957_v54 = vsel %vm1758_vm2, %v4516_v50, 0.0 }
 0x29a   : > { %3709 = vpow2.f32 %v1905_v36  ;;  %v1866_v20 = vsub.f32 %v4409_v37, %v1794_v62  ;;  %v1867_v39 = vsub.f32 %v4419_v0, %v1797_v9  ;;  %1958 = vadd.xlane.f32.xlu0 %v1957_v54 }
 0x29b   : > { %v4524_v29 = vpop.eup %3697  ;;  %3711 = vpow2.f32 %v1907_v14 }
 0x29c   : > { %v4526_v58 = vpop.eup %3699  ;;  %v1909_v1 = vmul.f32 1.442695, %v1866_v20  ;;  %v1911_v18 = vmul.f32 1.442695, %v1867_v39  ;;  %v1960_v34 = vsel %vm1758_vm2, %v4524_v29, 0.0 }
 0x29d   : > { %v1800_v23 = vpop.xlane.xlu1 %1799  ;;  %v1803_v5 = vpop.xlane.xlu0 %1802  ;;  %1961 = vadd.xlane.f32.xlu1 %v1960_v34  ;;  %v1963_v52 = vsel %vm1758_vm2, %v4526_v58, 0.0 }
 0x29e   : > { %3713 = vpow2.f32 %v1909_v1  ;;  %v1868_v37 = vsub.f32 %v4417_v47, %v1800_v23  ;;  %v1869_v0 = vsub.f32 %v4427_v55, %v1803_v5  ;;  %1964 = vadd.xlane.f32.xlu0 %v1963_v52 }
 0x29f   : > { %v4534_v19 = vpop.eup %3701  ;;  %3715 = vpow2.f32 %v1911_v18 }
 0x2a0   : > { %v4536_v49 = vpop.eup %3703  ;;  %v1913_v17 = vmul.f32 1.442695, %v1868_v37  ;;  %v1915_v53 = vmul.f32 1.442695, %v1869_v0  ;;  %v1966_v6 = vsel %vm1758_vm2, %v4534_v19, 0.0 }
 0x2a1   : > { %v1806_v25 = vpop.xlane.xlu1 %1805  ;;  %v1809_v10 = vpop.xlane.xlu0 %1808  ;;  %1967 = vadd.xlane.f32.xlu1 %v1966_v6  ;;  %v1969_v41 = vsel %vm1758_vm2, %v4536_v49, 0.0 }
 0x2a2   : > { %3717 = vpow2.f32 %v1913_v17  ;;  %v1870_v47 = vsub.f32 %v4425_v8, %v1806_v25  ;;  %v1871_v55 = vsub.f32 %v4435_v15, %v1809_v10  ;;  %1970 = vadd.xlane.f32.xlu0 %v1969_v41 }
 0x2a3   : > { %v4544_v7 = vpop.eup %3705  ;;  %3719 = vpow2.f32 %v1915_v53 }
 0x2a4   : > { %v4546_v59 = vpop.eup %3707  ;;  %v1917_v57 = vmul.f32 1.442695, %v1870_v47  ;;  %v1919_v40 = vmul.f32 1.442695, %v1871_v55  ;;  %v1972_v16 = vsel %vm1758_vm2, %v4544_v7, 0.0 }
 0x2a5   : > { %v1812_v31 = vpop.xlane.xlu1 %1811  ;;  %v1815_v51 = vpop.xlane.xlu0 %1814  ;;  %1973 = vadd.xlane.f32.xlu1 %v1972_v16  ;;  %v1975_v24 = vsel %vm1758_vm2, %v4546_v59, 0.0 }
 0x2a6   : > { %3721 = vpow2.f32 %v1917_v57  ;;  %v1872_v8 = vsub.f32 %v4433_v60, %v1812_v31  ;;  %v1873_v15 = vsub.f32 %v4443_v35, %v1815_v51  ;;  %1976 = vadd.xlane.f32.xlu0 %v1975_v24 }
 0x2a7   : > { %v4554_v21 = vpop.eup %3709  ;;  %3723 = vpow2.f32 %v1919_v40 }
 0x2a8   : > { %v4556_v26 = vpop.eup %3711  ;;  %v1921_v30 = vmul.f32 1.442695, %v1872_v8  ;;  %v1923_v63 = vmul.f32 1.442695, %v1873_v15  ;;  %v1978_v2 = vsel %vm1758_vm2, %v4554_v21, 0.0 }
 0x2a9   : > { %v1818_v61 = vpop.xlane.xlu1 %1817  ;;  %v1821_v28 = vpop.xlane.xlu0 %1820  ;;  %1979 = vadd.xlane.f32.xlu1 %v1978_v2  ;;  %v1981_v48 = vsel %vm1758_vm2, %v4556_v26, 0.0 }
 0x2aa   : > { %3725 = vpow2.f32 %v1921_v30  ;;  %v1874_v60 = vsub.f32 %v4441_v45, %v1818_v61  ;;  %v1875_v35 = vsub.f32 %v4451_v11, %v1821_v28  ;;  %1982 = vadd.xlane.f32.xlu0 %v1981_v48 }
 0x2ab   : > { %v4564_v36 = vpop.eup %3713  ;;  %3727 = vpow2.f32 %v1923_v63 }
 0x2ac   : > { %v4566_v14 = vpop.eup %3715  ;;  %v1925_v22 = vmul.f32 1.442695, %v1874_v60  ;;  %v1927_v62 = vmul.f32 1.442695, %v1875_v35  ;;  %v1984_v9 = vsel %vm1758_vm2, %v4564_v36, 0.0 }
 0x2ad   : > { %v1824_v54 = vpop.xlane.xlu1 %1823  ;;  %v1827_v20 = vpop.xlane.xlu0 %1826  ;;  %1985 = vadd.xlane.f32.xlu1 %v1984_v9  ;;  %v1987_v39 = vsel %vm1758_vm2, %v4566_v14, 0.0 }
 0x2ae   : > { %3729 = vpow2.f32 %v1925_v22  ;;  %v1876_v45 = vsub.f32 %v4449_v3, %v1824_v54  ;;  %v1877_v11 = vsub.f32 %v4459_v43, %v1827_v20  ;;  %1988 = vadd.xlane.f32.xlu0 %v1987_v39 }
 0x2af   : > { %v4574_v1 = vpop.eup %3717  ;;  %3731 = vpow2.f32 %v1927_v62 }
 0x2b0   : > { %v4576_v18 = vpop.eup %3719  ;;  %v1929_v34 = vmul.f32 1.442695, %v1876_v45  ;;  %v1931_v23 = vmul.f32 1.442695, %v1877_v11  ;;  %v1990_v5 = vsel %vm1758_vm2, %v4574_v1, 0.0 }
 0x2b1   : > { %v1830_v52 = vpop.xlane.xlu1 %1829  ;;  %v1833_v37 = vpop.xlane.xlu0 %1832  ;;  %1991 = vadd.xlane.f32.xlu1 %v1990_v5  ;;  %v1993_v0 = vsel %vm1758_vm2, %v4576_v18, 0.0 }
 0x2b2   : > { %3733 = vpow2.f32 %v1929_v34  ;;  %v1878_v3 = vsub.f32 %v4457_v27, %v1830_v52  ;;  %v1879_v43 = vsub.f32 %v4467_v46, %v1833_v37  ;;  %1994 = vadd.xlane.f32.xlu0 %v1993_v0 }
 0x2b3   : > { %v4584_v17 = vpop.eup %3721  ;;  %3735 = vpow2.f32 %v1931_v23 }
 0x2b4   : > { %v4586_v53 = vpop.eup %3723  ;;  %v1933_v6 = vmul.f32 1.442695, %v1878_v3  ;;  %v1935_v25 = vmul.f32 1.442695, %v1879_v43  ;;  %v1996_v10 = vsel %vm1758_vm2, %v4584_v17, 0.0 }
 0x2b5   : > { %v1836_v41 = vpop.xlane.xlu1 %1835  ;;  %v1839_v47 = vpop.xlane.xlu0 %1838  ;;  %1997 = vadd.xlane.f32.xlu1 %v1996_v10  ;;  %v1999_v55 = vsel %vm1758_vm2, %v4586_v53, 0.0 }
 0x2b6   : > { %3737 = vpow2.f32 %v1933_v6  ;;  %v1880_v27 = vsub.f32 %v4465_v42, %v1836_v41  ;;  %v1881_v46 = vsub.f32 %v4475_v44, %v1839_v47  ;;  %2000 = vadd.xlane.f32.xlu0 %v1999_v55 }
 0x2b7   : > { %v4594_v57 = vpop.eup %3725  ;;  %3739 = vpow2.f32 %v1935_v25 }
 0x2b8   : > { %v4596_v40 = vpop.eup %3727  ;;  %v1937_v16 = vmul.f32 1.442695, %v1880_v27  ;;  %v1939_v31 = vmul.f32 1.442695, %v1881_v46  ;;  %v2002_v51 = vsel %vm1758_vm2, %v4594_v57, 0.0 }
 0x2b9   : > { %v1842_v24 = vpop.xlane.xlu1 %1841  ;;  %v1845_v8 = vpop.xlane.xlu0 %1844  ;;  %2003 = vadd.xlane.f32.xlu1 %v2002_v51  ;;  %v2005_v15 = vsel %vm1758_vm2, %v4596_v40, 0.0  ;;  %v2453_v51 = vld [vmem:[%s5001_s8 + $0x68] sm:$0xff] }
 0x2ba   : > { %3741 = vpow2.f32 %v1937_v16  ;;  %v1882_v42 = vsub.f32 %v4473_v32, %v1842_v24  ;;  %v1883_v44 = vsub.f32 %v4483_v13, %v1845_v8  ;;  %2006 = vadd.xlane.f32.xlu0 %v2005_v15  ;;  %v2455_v16 = vld [vmem:[%s5001_s8 + $0x78] sm:$0xff]  ;;  %v2452_v24 = vld [vmem:[%s5001_s8 + $0x60] sm:$0xff]  ;;  %v2450_v15 = vld [vmem:[%s5001_s8 + $0x50] sm:$0xff] }
 0x2bb   : > { %v4604_v30 = vpop.eup %3729  ;;  %3743 = vpow2.f32 %v1939_v31  ;;  %v2454_v31 = vld [vmem:[%s5001_s8 + $0x70] sm:$0xff]  ;;  %3587 = vmatprep.subr.mxu1 %v2455_v16  ;;  %v2451_v8 = vld [vmem:[%s5001_s8 + $0x58] sm:$0xff] }
 0x2bc   : > { %v4606_v63 = vpop.eup %3731  ;;  %v1941_v2 = vmul.f32 1.442695, %v1882_v42  ;;  %v1943_v61 = vmul.f32 1.442695, %v1883_v44  ;;  %v2008_v28 = vsel %vm1758_vm2, %v4604_v30, 0.0  ;;  %3588 = vmatpush3.msra.mxu1 %v2455_v16  ;;  %v2449_v42 = vld [vmem:[%s5001_s8 + $0x48] sm:$0xff] }
 0x2bd   : > { %v1848_v48 = vpop.xlane.xlu1 %1847  ;;  %2009 = vadd.xlane.f32.xlu1 %v2008_v28  ;;  %v2011_v60 = vsel %vm1758_vm2, %v4606_v63, 0.0  ;;  %v1851_v35 = vpop.xlane.xlu0 %1850  ;;  %3589 = vmatprep.subr.mxu1 %v2454_v31  ;;  %v2448_v44 = vld [vmem:[%s5001_s8 + $0x40] sm:$0xff]  ;;  %v2445_v28 = vld [vmem:[%s5001_s8 + $0x28] sm:$0xff] }
 0x2be   : > { %3745 = vpow2.f32 %v1941_v2  ;;  %v1884_v32 = vsub.f32 %v4481_v4, %v1848_v48  ;;  %2012 = vadd.xlane.f32.xlu0 %v2011_v60  ;;  %v1885_v13 = vsub.f32 %v4491_v56, %v1851_v35  ;;  %3590 = vmatpush3.msra.mxu1 %v2454_v31  ;;  %v2447_v2 = vld [vmem:[%s5001_s8 + $0x38] sm:$0xff]  ;;  %v2444_v48 = vld [vmem:[%s5001_s8 + $0x20] sm:$0xff]  ;;  %v2442_v35 = vld [vmem:[%s5001_s8 + $0x10] sm:$0xff] }
 0x2bf   : > { %v4614_v22 = vpop.eup %3733  ;;  %3747 = vpow2.f32 %v1943_v61  ;;  %3591 = vmatprep.subr.mxu1 %v2453_v51  ;;  %v2446_v61 = vld [vmem:[%s5001_s8 + $0x30] sm:$0xff]  ;;  %v2443_v60 = vld [vmem:[%s5001_s8 + $0x18] sm:$0xff] }
 0x2c0   : > { %v4616_v62 = vpop.eup %3735  ;;  %v1945_v9 = vmul.f32 1.442695, %v1884_v32  ;;  %v1947_v54 = vmul.f32 1.442695, %v1885_v13  ;;  %v2014_v20 = vsel %vm1758_vm2, %v4614_v22, 0.0  ;;  %3592 = vmatpush3.msra.mxu1 %v2453_v51 }
 0x2c1   : > { %2015 = vadd.xlane.f32.xlu1 %v2014_v20  ;;  %v1854_v39 = vpop.xlane.xlu1 %1853  ;;  %v2017_v45 = vsel %vm1758_vm2, %v4616_v62, 0.0  ;;  %3593 = vmatprep.subr.mxu1 %v2452_v24 }
 0x2c2   : > { %3749 = vpow2.f32 %v1945_v9  ;;  %v1886_v4 = vsub.f32 %v4489_v38, %v1854_v39  ;;  %2018 = vadd.xlane.f32.xlu0 %v2017_v45  ;;  %3594 = vmatpush3.msra.mxu1 %v2452_v24 }
 0x2c3   : > { %v4623_v56 = vpop.eup %3737  ;;  %3751 = vpow2.f32 %v1947_v54  ;;  %3595 = vmatprep.subr.mxu1 %v2451_v8 }
 0x2c4   : > { %v4625_v11 = vpop.eup %3739  ;;  %v1949_v34 = vmul.f32 1.442695, %v1886_v4  ;;  %v2020_v23 = vsel %vm1758_vm2, %v4623_v56, 0.0  ;;  %3596 = vmatpush3.msra.mxu1 %v2451_v8 }
 0x2c5   : > { %2021 = vadd.xlane.f32.xlu1 %v2020_v23  ;;  %v2023_v5 = vsel %vm1758_vm2, %v4625_v11, 0.0  ;;  %3597 = vmatprep.subr.mxu1 %v2450_v15 }
 0x2c6   : > { %3753 = vpow2.f32 %v1949_v34  ;;  %2024 = vadd.xlane.f32.xlu0 %v2023_v5  ;;  %3598 = vmatpush3.msra.mxu1 %v2450_v15 }
 0x2c7   : > { %v4631_v52 = vpop.eup %3741  ;;  %3599 = vmatprep.subr.mxu1 %v2449_v42 }
 0x2c8   : > { %v4633_v37 = vpop.eup %3743  ;;  %v2026_v38 = vsel %vm1758_vm2, %v4631_v52, 0.0  ;;  %3600 = vmatpush3.msra.mxu1 %v2449_v42 }
 0x2c9   : > { %2027 = vadd.xlane.f32.xlu1 %v2026_v38  ;;  %v2029_v0 = vsel %vm1758_vm2, %v4633_v37, 0.0  ;;  %3601 = vmatprep.subr.mxu1 %v2448_v44 }
 0x2ca   : > { %2030 = vadd.xlane.f32.xlu0 %v2029_v0  ;;  %3602 = vmatpush3.msra.mxu1 %v2448_v44 }
 0x2cb   : > { %v4639_v3 = vpop.eup %3745  ;;  %3603 = vmatprep.subr.mxu1 %v2447_v2 }
 0x2cc   : > { %v4641_v43 = vpop.eup %3747  ;;  %v2032_v6 = vsel %vm1758_vm2, %v4639_v3, 0.0  ;;  %3604 = vmatpush3.msra.mxu1 %v2447_v2 }
 0x2cd   : > { %2033 = vadd.xlane.f32.xlu1 %v2032_v6  ;;  %v2035_v25 = vsel %vm1758_vm2, %v4641_v43, 0.0  ;;  %3605 = vmatprep.subr.mxu1 %v2446_v61 }
 0x2ce   : > { %2036 = vadd.xlane.f32.xlu0 %v2035_v25  ;;  %3606 = vmatpush3.msra.mxu1 %v2446_v61 }
 0x2cf   : > { %v4647_v10 = vpop.eup %3749  ;;  %3607 = vmatprep.subr.mxu1 %v2445_v28 }
 0x2d0   : > { %v4649_v41 = vpop.eup %3751  ;;  %v2038_v47 = vsel %vm1758_vm2, %v4647_v10, 0.0  ;;  %3608 = vmatpush3.msra.mxu1 %v2445_v28 }
 0x2d1   : > { %2039 = vadd.xlane.f32.xlu1 %v2038_v47  ;;  %v2041_v55 = vsel %vm1758_vm2, %v4649_v41, 0.0  ;;  %3609 = vmatprep.subr.mxu1 %v2444_v48 }
 0x2d2   : > { %2042 = vadd.xlane.f32.xlu0 %v2041_v55  ;;  %3610 = vmatpush3.msra.mxu1 %v2444_v48 }
 0x2d3   : > { %v4655_v27 = vpop.eup %3753  ;;  %3611 = vmatprep.subr.mxu1 %v2443_v60 }
 0x2d4   : > { %v2044_v46 = vsel %vm1758_vm2, %v4655_v27, 0.0  ;;  %3612 = vmatpush3.msra.mxu1 %v2443_v60 }
 0x2d5   : > { %2045 = vadd.xlane.f32.xlu1 %v2044_v46  ;;  %3613 = vmatprep.subr.mxu1 %v2442_v35 }
 0x2d6   : > { %3614 = vmatpush3.msra.mxu1 %v2442_v35 }
 0x31e   : > { %v1953_v32 = vpop.xlane.xlu0 %1952 }
 0x31f   : > { %3755 = vrcp.f32 %v1953_v32 }
 0x322   : > { %v1956_v13 = vpop.xlane.xlu1 %1955 }
 0x323   : > { %3757 = vrcp.f32 %v1956_v13  ;;  %v1959_v9 = vpop.xlane.xlu0 %1958 }
 0x324   : > { %3759 = vrcp.f32 %v1959_v9 }
 0x326   : > { %v1962_v54 = vpop.xlane.xlu1 %1961 }
 0x327   : > { %3761 = vrcp.f32 %v1962_v54  ;;  %v1965_v20 = vpop.xlane.xlu0 %1964 }
 0x328   : > { %3763 = vrcp.f32 %v1965_v20 }
 0x32a   : > { %v1968_v39 = vpop.xlane.xlu1 %1967 }
 0x32b   : > { %3765 = vrcp.f32 %v1968_v39  ;;  %v1971_v45 = vpop.xlane.xlu0 %1970 }
 0x32c   : > { %v3756_v4 = vpop.eup %3755  ;;  %3767 = vrcp.f32 %v1971_v45 }
 0x32d   : > { %v2048_v34 = vmul.f32 %v3756_v4, %v4508_v12 }
 0x32e   : > { %v1974_v23 = vpop.xlane.xlu1 %1973 }
 0x32f   : > { %3769 = vrcp.f32 %v1974_v23  ;;  %v1977_v5 = vpop.xlane.xlu0 %1976  ;;  %3539 = vmatprep.mubr.msk.f32.mxu0 %vm1758_vm2, %v2048_v34 }
 0x330   : > { %v3758_v38 = vpop.eup %3757  ;;  %3771 = vrcp.f32 %v1977_v5 }
 0x331   : > { %v3760_v0 = vpop.eup %3759  ;;  %v2050_v6 = vmul.f32 %v3758_v38, %v4514_v33 }
 0x332   : > { %v1980_v25 = vpop.xlane.xlu1 %1979  ;;  %v2052_v47 = vmul.f32 %v3760_v0, %v4516_v50 }
 0x333   : > { %3773 = vrcp.f32 %v1980_v25  ;;  %v1983_v55 = vpop.xlane.xlu0 %1982  ;;  %3540 = vmatmul.mubr.msk.f32.vlgmr.msra.gmra.mxu0 %vm1758_vm2, %v2050_v6 }
 0x334   : > { %v3762_v46 = vpop.eup %3761  ;;  %3775 = vrcp.f32 %v1983_v55  ;;  %3542 = vmatprep.mubr.msk.f32.mxu0 %vm1758_vm2, %v2052_v47 }
 0x335   : > { %v3764_v12 = vpop.eup %3763  ;;  %v2054_v16 = vmul.f32 %v3762_v46, %v4524_v29 }
 0x336   : > { %v1986_v31 = vpop.xlane.xlu1 %1985  ;;  %v2056_v51 = vmul.f32 %v3764_v12, %v4526_v58 }
 0x337   : > { %3777 = vrcp.f32 %v1986_v31  ;;  %v1989_v24 = vpop.xlane.xlu0 %1988  ;;  %3543 = vmatmul.mubr.msk.f32.gmra.mxu0 %vm1758_vm2, %v2054_v16 }
 0x338   : > { %v3766_v33 = vpop.eup %3765  ;;  %3779 = vrcp.f32 %v1989_v24  ;;  %3545 = vmatprep.mubr.msk.f32.mxu0 %vm1758_vm2, %v2056_v51 }
 0x339   : > { %v3768_v50 = vpop.eup %3767  ;;  %v2058_v8 = vmul.f32 %v3766_v33, %v4534_v19 }
 0x33a   : > { %v1992_v15 = vpop.xlane.xlu1 %1991  ;;  %v2060_v42 = vmul.f32 %v3768_v50, %v4536_v49 }
 0x33b   : > { %3781 = vrcp.f32 %v1992_v15  ;;  %v1995_v44 = vpop.xlane.xlu0 %1994  ;;  %3546 = vmatmul.mubr.msk.f32.gmra.mxu0 %vm1758_vm2, %v2058_v8 }
 0x33c   : > { %v3770_v29 = vpop.eup %3769  ;;  %3783 = vrcp.f32 %v1995_v44  ;;  %3548 = vmatprep.mubr.msk.f32.mxu0 %vm1758_vm2, %v2060_v42 }
 0x33d   : > { %v3772_v58 = vpop.eup %3771  ;;  %v2062_v2 = vmul.f32 %v3770_v29, %v4544_v7 }
 0x33e   : > { %v1998_v61 = vpop.xlane.xlu1 %1997  ;;  %v2064_v28 = vmul.f32 %v3772_v58, %v4546_v59 }
 0x33f   : > { %3785 = vrcp.f32 %v1998_v61  ;;  %v2001_v48 = vpop.xlane.xlu0 %2000  ;;  %3549 = vmatmul.mubr.msk.f32.gmra.mxu0 %vm1758_vm2, %v2062_v2 }
 0x340   : > { %v3774_v19 = vpop.eup %3773  ;;  %3787 = vrcp.f32 %v2001_v48  ;;  %3551 = vmatprep.mubr.msk.f32.mxu0 %vm1758_vm2, %v2064_v28 }
 0x341   : > { %v3776_v49 = vpop.eup %3775  ;;  %v2066_v60 = vmul.f32 %v3774_v19, %v4554_v21 }
 0x342   : > { %v2004_v35 = vpop.xlane.xlu1 %2003  ;;  %v2068_v32 = vmul.f32 %v3776_v49, %v4556_v26 }
 0x343   : > { %3789 = vrcp.f32 %v2004_v35  ;;  %v2007_v13 = vpop.xlane.xlu0 %2006  ;;  %3552 = vmatmul.mubr.msk.f32.gmra.mxu0 %vm1758_vm2, %v2066_v60 }
 0x344   : > { %v3778_v7 = vpop.eup %3777  ;;  %3791 = vrcp.f32 %v2007_v13  ;;  %3554 = vmatprep.mubr.msk.f32.mxu0 %vm1758_vm2, %v2068_v32 }
 0x345   : > { %v3780_v59 = vpop.eup %3779  ;;  %v2070_v9 = vmul.f32 %v3778_v7, %v4564_v36 }
 0x346   : > { %v2010_v54 = vpop.xlane.xlu1 %2009  ;;  %v2072_v20 = vmul.f32 %v3780_v59, %v4566_v14 }
 0x347   : > { %3793 = vrcp.f32 %v2010_v54  ;;  %v2013_v39 = vpop.xlane.xlu0 %2012  ;;  %3555 = vmatmul.mubr.msk.f32.gmra.mxu0 %vm1758_vm2, %v2070_v9 }
 0x348   : > { %v3782_v21 = vpop.eup %3781  ;;  %3795 = vrcp.f32 %v2013_v39  ;;  %3557 = vmatprep.mubr.msk.f32.mxu0 %vm1758_vm2, %v2072_v20 }
 0x349   : > { %v3784_v26 = vpop.eup %3783  ;;  %v2074_v45 = vmul.f32 %v3782_v21, %v4574_v1 }
 0x34a   : > { %v2016_v4 = vpop.xlane.xlu1 %2015  ;;  %v2076_v34 = vmul.f32 %v3784_v26, %v4576_v18 }
 0x34b   : > { %3797 = vrcp.f32 %v2016_v4  ;;  %v2019_v23 = vpop.xlane.xlu0 %2018  ;;  %3558 = vmatmul.mubr.msk.f32.gmra.mxu0 %vm1758_vm2, %v2074_v45 }
 0x34c   : > { %v3786_v36 = vpop.eup %3785  ;;  %3799 = vrcp.f32 %v2019_v23  ;;  %3560 = vmatprep.mubr.msk.f32.mxu0 %vm1758_vm2, %v2076_v34 }
 0x34d   : > { %v3788_v14 = vpop.eup %3787  ;;  %v2078_v5 = vmul.f32 %v3786_v36, %v4584_v17 }
 0x34e   : > { %v2022_v38 = vpop.xlane.xlu1 %2021  ;;  %v2080_v0 = vmul.f32 %v3788_v14, %v4586_v53 }
 0x34f   : > { %3801 = vrcp.f32 %v2022_v38  ;;  %v2025_v6 = vpop.xlane.xlu0 %2024  ;;  %3561 = vmatmul.mubr.msk.f32.gmra.mxu0 %vm1758_vm2, %v2078_v5 }
 0x350   : > { %v3790_v1 = vpop.eup %3789  ;;  %3803 = vrcp.f32 %v2025_v6  ;;  %3563 = vmatprep.mubr.msk.f32.mxu0 %vm1758_vm2, %v2080_v0 }
 0x351   : > { %v3792_v18 = vpop.eup %3791  ;;  %v2082_v25 = vmul.f32 %v3790_v1, %v4594_v57 }
 0x352   : > { %v2028_v47 = vpop.xlane.xlu1 %2027  ;;  %v2084_v55 = vmul.f32 %v3792_v18, %v4596_v40 }
 0x353   : > { %3805 = vrcp.f32 %v2028_v47  ;;  %v2031_v46 = vpop.xlane.xlu0 %2030  ;;  %3564 = vmatmul.mubr.msk.f32.gmra.mxu0 %vm1758_vm2, %v2082_v25 }
 0x354   : > { %v3794_v17 = vpop.eup %3793  ;;  %3807 = vrcp.f32 %v2031_v46  ;;  %3566 = vmatprep.mubr.msk.f32.mxu0 %vm1758_vm2, %v2084_v55 }
 0x355   : > { %v3796_v53 = vpop.eup %3795  ;;  %v2086_v12 = vmul.f32 %v3794_v17, %v4604_v30 }
 0x356   : > { %v2034_v16 = vpop.xlane.xlu1 %2033  ;;  %v2088_v31 = vmul.f32 %v3796_v53, %v4606_v63  ;;  %v4774_v53 = vld [vmem:[%s5002_s9] ss:$0 sm:$0xff] }
 0x357   : > { %3809 = vrcp.f32 %v2034_v16  ;;  %v2037_v51 = vpop.xlane.xlu0 %2036  ;;  %3567 = vmatmul.mubr.msk.f32.gmra.mxu0 %vm1758_vm2, %v2086_v12  ;;  %v4779_v16 = vld [vmem:[%s5003_s10] ss:$0 sm:$0xff] }
 0x358   : > { %v3798_v57 = vpop.eup %3797  ;;  %3811 = vrcp.f32 %v2037_v51  ;;  %3569 = vmatprep.mubr.msk.f32.mxu0 %vm1758_vm2, %v2088_v31  ;;  %v4785_v51 = vld [vmem:[%s5004_s11] ss:$0 sm:$0xff] }
 0x359   : > { %v3800_v40 = vpop.eup %3799  ;;  %v2090_v24 = vmul.f32 %v3798_v57, %v4614_v22 }
 0x35a   : > { %v2040_v33 = vpop.xlane.xlu1 %2039  ;;  %v2092_v50 = vmul.f32 %v3800_v40, %v4616_v62 }
 0x35b   : > { %3813 = vrcp.f32 %v2040_v33  ;;  %v2043_v8 = vpop.xlane.xlu0 %2042  ;;  %3570 = vmatmul.mubr.msk.f32.gmra.mxu0 %vm1758_vm2, %v2090_v24 }
 0x35c   : > { %v3802_v30 = vpop.eup %3801  ;;  %3815 = vrcp.f32 %v2043_v8  ;;  %3572 = vmatprep.mubr.msk.f32.mxu0 %vm1758_vm2, %v2092_v50 }
 0x35d   : > { %v3804_v63 = vpop.eup %3803  ;;  %v2094_v15 = vmul.f32 %v3802_v30, %v4623_v56 }
 0x35e   : > { %v2046_v42 = vpop.xlane.xlu1 %2045  ;;  %v2096_v44 = vmul.f32 %v3804_v63, %v4625_v11 }
 0x35f   : > { %3817 = vrcp.f32 %v2046_v42  ;;  %3573 = vmatmul.mubr.msk.f32.gmra.mxu0 %vm1758_vm2, %v2094_v15  ;;  %v3819_v15 = vld [vmem:[%s4074_s19 + $0x8] sm:$0xff] }
 0x360   : > { %v3806_v22 = vpop.eup %3805  ;;  %3575 = vmatprep.mubr.msk.f32.mxu0 %vm1758_vm2, %v2096_v44 }
 0x361   : > { %v3808_v62 = vpop.eup %3807  ;;  %v2098_v29 = vmul.f32 %v3806_v22, %v4631_v52 }
 0x362   : > { %v2100_v58 = vmul.f32 %v3808_v62, %v4633_v37 }
 0x363   : > { %3576 = vmatmul.mubr.msk.f32.gmra.mxu0 %vm1758_vm2, %v2098_v29 }
 0x364   : > { %v3810_v2 = vpop.eup %3809  ;;  %3578 = vmatprep.mubr.msk.f32.mxu0 %vm1758_vm2, %v2100_v58  ;;  %v3820_v58 = vld [vmem:[%s4074_s19] sm:$0xff] }
 0x365   : > { %v3812_v56 = vpop.eup %3811  ;;  %v2102_v61 = vmul.f32 %v3810_v2, %v4639_v3  ;;  %v2441_v3 = vld [vmem:[%s5001_s8 + $0x8] sm:$0xff] }
 0x366   : > { %v2104_v11 = vmul.f32 %v3812_v56, %v4641_v43  ;;  %3615 = vmatprep.subr.mxu1 %v2441_v3  ;;  %v2440_v43 = vld [vmem:[%s5001_s8] sm:$0xff] }
 0x367   : > { %3579 = vmatmul.mubr.msk.f32.gmra.mxu0 %vm1758_vm2, %v2102_v61  ;;  %3616 = vmatpush3.msra.mxu1 %v2441_v3 }
 0x368   : > { %v3814_v28 = vpop.eup %3813  ;;  %3581 = vmatprep.mubr.msk.f32.mxu0 %vm1758_vm2, %v2104_v11  ;;  %3617 = vmatprep.subr.mxu1 %v2440_v43 }
 0x369   : > { %v3816_v48 = vpop.eup %3815  ;;  %v2106_v52 = vmul.f32 %v3814_v28, %v4647_v10  ;;  %3618 = vmatpush3.msra.mxu1 %v2440_v43  ;;  %v3822_v43 = vld [vmem:[%s4074_s19 + $0x10] sm:$0xff] }
 0x36a   : > { %v2108_v37 = vmul.f32 %v3816_v48, %v4649_v41  ;;  %v3821_v48 = vld [vmem:[%s4074_s19 + $0x18] sm:$0xff] }
 0x36b   : > { %3582 = vmatmul.mubr.msk.f32.gmra.mxu0 %vm1758_vm2, %v2106_v52 }
 0x36c   : > { %v3818_v19 = vpop.eup %3817  ;;  %3584 = vmatprep.mubr.msk.f32.mxu0 %vm1758_vm2, %v2108_v37 }
 0x36d   : > { %v2110_v49 = vmul.f32 %v3818_v19, %v4655_v27 }
 0x36f   : > { %3585 = vmatmul.mubr.msk.f32.gmra.mxu0 %vm1758_vm2, %v2110_v49 }
 0x3f3   : > { %v3541_v10 = vpop.f32.mrf.mxu0 }
 0x3f5   : > { %v2281_v41 = vpop.f32.mrf.mxu0 }
 0x3f6   : > { %3619 = vmatprep.mubr.f32.mxu1 %v2281_v41 }
 0x3f7   : > { %v3544_v60 = vpop.f32.mrf.mxu0  ;;  %3620 = vmatmul.mubr.f32.vlgmr.msra.gmra.mxu1 %v3541_v10 }
 0x3f9   : > { %v2291_v27 = vpop.f32.mrf.mxu0 }
 0x3fa   : > { %3622 = vmatprep.mubr.f32.mxu1 %v2291_v27 }
 0x3fb   : > { %v3547_v35 = vpop.f32.mrf.mxu0  ;;  %3623 = vmatmul.mubr.f32.gmra.mxu1 %v3544_v60 }
 0x3fd   : > { %v2301_v32 = vpop.f32.mrf.mxu0 }
 0x3fe   : > { %3625 = vmatprep.mubr.f32.mxu1 %v2301_v32  ;;  %v3823_v32 = vld [vmem:[%s4074_s19 + $0x28] sm:$0xff] }
 0x3ff   : > { %v3550_v13 = vpop.f32.mrf.mxu0  ;;  %3626 = vmatmul.mubr.f32.gmra.mxu1 %v3547_v35 }
 0x401   : > { %v2311_v7 = vpop.f32.mrf.mxu0 }
 0x402   : > { %3628 = vmatprep.mubr.f32.mxu1 %v2311_v7 }
 0x403   : > { %v3553_v59 = vpop.f32.mrf.mxu0  ;;  %3629 = vmatmul.mubr.f32.gmra.mxu1 %v3550_v13 }
 0x405   : > { %v2321_v9 = vpop.f32.mrf.mxu0 }
 0x406   : > { %3631 = vmatprep.mubr.f32.mxu1 %v2321_v9 }
 0x407   : > { %v3556_v54 = vpop.f32.mrf.mxu0  ;;  %3632 = vmatmul.mubr.f32.gmra.mxu1 %v3553_v59 }
 0x409   : > { %v2331_v20 = vpop.f32.mrf.mxu0 }
 0x40a   : > { %3634 = vmatprep.mubr.f32.mxu1 %v2331_v20  ;;  %v3824_v20 = vld [vmem:[%s4074_s19 + $0x20] sm:$0xff] }
 0x40b   : > { %v3559_v39 = vpop.f32.mrf.mxu0  ;;  %3635 = vmatmul.mubr.f32.gmra.mxu1 %v3556_v54 }
 0x40d   : > { %v2341_v21 = vpop.f32.mrf.mxu0 }
 0x40e   : > { %3637 = vmatprep.mubr.f32.mxu1 %v2341_v21 }
 0x40f   : > { %v3562_v26 = vpop.f32.mrf.mxu0  ;;  %3638 = vmatmul.mubr.f32.gmra.mxu1 %v3559_v39 }
 0x411   : > { %v2351_v45 = vpop.f32.mrf.mxu0 }
 0x412   : > { %3640 = vmatprep.mubr.f32.mxu1 %v2351_v45 }
 0x413   : > { %v3565_v4 = vpop.f32.mrf.mxu0  ;;  %3641 = vmatmul.mubr.f32.gmra.mxu1 %v3562_v26 }
 0x415   : > { %v2361_v34 = vpop.f32.mrf.mxu0 }
 0x416   : > { %3643 = vmatprep.mubr.f32.mxu1 %v2361_v34  ;;  %v3825_v34 = vld [vmem:[%s4074_s19 + $0x38] sm:$0xff] }
 0x417   : > { %v3568_v23 = vpop.f32.mrf.mxu0  ;;  %3644 = vmatmul.mubr.f32.gmra.mxu1 %v3565_v4 }
 0x419   : > { %v2371_v36 = vpop.f32.mrf.mxu0 }
 0x41a   : > { %3646 = vmatprep.mubr.f32.mxu1 %v2371_v36 }
 0x41b   : > { %v3571_v14 = vpop.f32.mrf.mxu0  ;;  %3647 = vmatmul.mubr.f32.gmra.mxu1 %v3568_v23 }
 0x41d   : > { %v2381_v5 = vpop.f32.mrf.mxu0 }
 0x41e   : > { %3649 = vmatprep.mubr.f32.mxu1 %v2381_v5 }
 0x41f   : > { %v3574_v38 = vpop.f32.mrf.mxu0  ;;  %3650 = vmatmul.mubr.f32.gmra.mxu1 %v3571_v14 }
 0x421   : > { %v2391_v0 = vpop.f32.mrf.mxu0 }
 0x422   : > { %3652 = vmatprep.mubr.f32.mxu1 %v2391_v0  ;;  %v3826_v0 = vld [vmem:[%s4074_s19 + $0x30] sm:$0xff] }
 0x423   : > { %v3577_v6 = vpop.f32.mrf.mxu0  ;;  %3653 = vmatmul.mubr.f32.gmra.mxu1 %v3574_v38 }
 0x425   : > { %v2401_v1 = vpop.f32.mrf.mxu0 }
 0x426   : > { %3655 = vmatprep.mubr.f32.mxu1 %v2401_v1 }
 0x427   : > { %v3580_v18 = vpop.f32.mrf.mxu0  ;;  %3656 = vmatmul.mubr.f32.gmra.mxu1 %v3577_v6 }
 0x429   : > { %v2411_v25 = vpop.f32.mrf.mxu0 }
 0x42a   : > { %3658 = vmatprep.mubr.f32.mxu1 %v2411_v25 }
 0x42b   : > { %v3583_v47 = vpop.f32.mrf.mxu0  ;;  %3659 = vmatmul.mubr.f32.gmra.mxu1 %v3580_v18 }
 0x42d   : > { %v2421_v55 = vpop.f32.mrf.mxu0 }
 0x42e   : > { %3661 = vmatprep.mubr.f32.mxu1 %v2421_v55  ;;  %v3827_v55 = vld [vmem:[%s4074_s19 + $0x48] sm:$0xff] }
 0x42f   : > { %v3586_v46 = vpop.f32.mrf.mxu0  ;;  %3662 = vmatmul.mubr.f32.gmra.mxu1 %v3583_v47 }
 0x431   : > { %v2431_v17 = vpop.f32.mrf.mxu0 }
 0x432   : > { %3664 = vmatprep.mubr.f32.mxu1 %v2431_v17 }
 0x433   : > { %3665 = vmatmul.mubr.f32.gmra.mxu1 %v3586_v46 }
 0x4b7   : > { %v3621_v12 = vpop.f32.mrf.mxu1 }
 0x4b8   : > { %v2535_v31 = vadd.f32 %v3621_v12, %v4774_v53 }
 0x4b9   : > { %v2529_v57 = vpop.f32.mrf.mxu1 }
 0x4ba   : > { %v2696_v40 = vmul.f32 %v4779_v16, %v2535_v31  ;;  %v2530_v24 = vadd.f32 %v4774_v53, %v2529_v57 }
 0x4bb   : > { %v3624_v33 = vpop.f32.mrf.mxu1 }
 0x4bc   : > { %v2735_v50 = vadd.f32 %v4785_v51, %v2696_v40  ;;  %v2695_v8 = vmul.f32 %v4779_v16, %v2530_v24  ;;  %v2545_v30 = vadd.f32 %v3624_v33, %v4774_v53  ;;  %v3828_v40 = vld [vmem:[%s4074_s19 + $0x40] sm:$0xff] }
 0x4bd   : > { %v2539_v63 = vpop.f32.mrf.mxu1 }
 0x4be   : > { %v2767_v42 = vadd.f32 %v3819_v15, %v2735_v50  ;;  %v2734_v44 = vadd.f32 %v4785_v51, %v2695_v8  ;;  %v2698_v22 = vmul.f32 %v4779_v16, %v2545_v30  ;;  %v2540_v62 = vadd.f32 %v4774_v53, %v2539_v63  ;;  %v3829_v63 = vld [vmem:[%s4074_s19 + $0x58] sm:$0xff] }
 0x4bf   : > { %v3627_v29 = vpop.f32.mrf.mxu1 }
 0x4c0   : > { %2799 = vst.msk [vmem:[%s4796_s13 + $0x8] sm:$0xff] %vm511_vm1, %v2767_v42  ;;  %v2766_v2 = vadd.f32 %v3820_v58, %v2734_v44  ;;  %v2737_v56 = vadd.f32 %v4785_v51, %v2698_v22  ;;  %v2697_v61 = vmul.f32 %v4779_v16, %v2540_v62  ;;  %v2555_v11 = vadd.f32 %v3627_v29, %v4774_v53  ;;  %v3830_v29 = vld [vmem:[%s4074_s19 + $0x50] sm:$0xff] }
 0x4c1   : > { %v2549_v28 = vpop.f32.mrf.mxu1 }
 0x4c2   : > { %2798 = vst.msk [vmem:[%s4796_s13] sm:$0xff] %vm511_vm1, %v2766_v2  ;;  %v2769_v52 = vadd.f32 %v3821_v48, %v2737_v56  ;;  %v2736_v37 = vadd.f32 %v4785_v51, %v2697_v61  ;;  %v2700_v19 = vmul.f32 %v4779_v16, %v2555_v11  ;;  %v2550_v49 = vadd.f32 %v4774_v53, %v2549_v28  ;;  %v3831_v28 = vld [vmem:[%s4074_s19 + $0x68] sm:$0xff] }
 0x4c3   : > { %v3630_v3 = vpop.f32.mrf.mxu1 }
 0x4c4   : > { %2801 = vst.msk [vmem:[%s4796_s13 + $0x18] sm:$0xff] %vm511_vm1, %v2769_v52  ;;  %v2768_v10 = vadd.f32 %v3822_v43, %v2736_v37  ;;  %v2739_v41 = vadd.f32 %v4785_v51, %v2700_v19  ;;  %v2699_v60 = vmul.f32 %v4779_v16, %v2550_v49  ;;  %v2565_v27 = vadd.f32 %v3630_v3, %v4774_v53  ;;  %v3832_v3 = vld [vmem:[%s4074_s19 + $0x60] sm:$0xff] }
 0x4c5   : > { %v2559_v35 = vpop.f32.mrf.mxu1 }
 0x4c6   : > { %2800 = vst.msk [vmem:[%s4796_s13 + $0x10] sm:$0xff] %vm511_vm1, %v2768_v10  ;;  %v2771_v13 = vadd.f32 %v3823_v32, %v2739_v41  ;;  %v2738_v7 = vadd.f32 %v4785_v51, %v2699_v60  ;;  %v2702_v59 = vmul.f32 %v4779_v16, %v2565_v27  ;;  %v2560_v9 = vadd.f32 %v4774_v53, %v2559_v35  ;;  %v3833_v35 = vld [vmem:[%s4074_s19 + $0x78] sm:$0xff] }
 0x4c7   : > { %v3633_v54 = vpop.f32.mrf.mxu1 }
 0x4c8   : > { %2803 = vst.msk [vmem:[%s4796_s13 + $0x28] sm:$0xff] %vm511_vm1, %v2771_v13  ;;  %v2770_v39 = vadd.f32 %v3824_v20, %v2738_v7  ;;  %v2741_v21 = vadd.f32 %v4785_v51, %v2702_v59  ;;  %v2701_v26 = vmul.f32 %v4779_v16, %v2560_v9  ;;  %v2575_v45 = vadd.f32 %v3633_v54, %v4774_v53  ;;  %v3834_v54 = vld [vmem:[%s4074_s19 + $0x70] sm:$0xff] }
 0x4c9   : > { %v2569_v4 = vpop.f32.mrf.mxu1 }
 0x4ca   : > { %2802 = vst.msk [vmem:[%s4796_s13 + $0x20] sm:$0xff] %vm511_vm1, %v2770_v39  ;;  %v2773_v23 = vadd.f32 %v3825_v34, %v2741_v21  ;;  %v2740_v36 = vadd.f32 %v4785_v51, %v2701_v26  ;;  %v2704_v14 = vmul.f32 %v4779_v16, %v2575_v45  ;;  %v2570_v5 = vadd.f32 %v4774_v53, %v2569_v4  ;;  %v3835_v4 = vld [vmem:[%s4074_s19 + $0x88] sm:$0xff] }
 0x4cb   : > { %v3636_v38 = vpop.f32.mrf.mxu1 }
 0x4cc   : > { %2805 = vst.msk [vmem:[%s4796_s13 + $0x38] sm:$0xff] %vm511_vm1, %v2773_v23  ;;  %v2772_v6 = vadd.f32 %v3826_v0, %v2740_v36  ;;  %v2743_v1 = vadd.f32 %v4785_v51, %v2704_v14  ;;  %v2703_v18 = vmul.f32 %v4779_v16, %v2570_v5  ;;  %v2585_v25 = vadd.f32 %v3636_v38, %v4774_v53  ;;  %v3836_v38 = vld [vmem:[%s4074_s19 + $0x80] sm:$0xff] }
 0x4cd   : > { %v2579_v47 = vpop.f32.mrf.mxu1 }
 0x4ce   : > { %2804 = vst.msk [vmem:[%s4796_s13 + $0x30] sm:$0xff] %vm511_vm1, %v2772_v6  ;;  %v2775_v46 = vadd.f32 %v3827_v55, %v2743_v1  ;;  %v2742_v17 = vadd.f32 %v4785_v51, %v2703_v18  ;;  %v2706_v12 = vmul.f32 %v4779_v16, %v2585_v25  ;;  %v2580_v31 = vadd.f32 %v4774_v53, %v2579_v47  ;;  %v3837_v47 = vld [vmem:[%s4074_s19 + $0x98] sm:$0xff] }
 0x4cf   : > { %v3639_v57 = vpop.f32.mrf.mxu1 }
 0x4d0   : > { %2807 = vst.msk [vmem:[%s4796_s13 + $0x48] sm:$0xff] %vm511_vm1, %v2775_v46  ;;  %v2774_v24 = vadd.f32 %v3828_v40, %v2742_v17  ;;  %v2745_v33 = vadd.f32 %v4785_v51, %v2706_v12  ;;  %v2705_v50 = vmul.f32 %v4779_v16, %v2580_v31  ;;  %v2595_v8 = vadd.f32 %v3639_v57, %v4774_v53  ;;  %v3838_v57 = vld [vmem:[%s4074_s19 + $0x90] sm:$0xff] }
 0x4d1   : > { %v2589_v30 = vpop.f32.mrf.mxu1 }
 0x4d2   : > { %2806 = vst.msk [vmem:[%s4796_s13 + $0x40] sm:$0xff] %vm511_vm1, %v2774_v24  ;;  %v2777_v15 = vadd.f32 %v3829_v63, %v2745_v33  ;;  %v2744_v42 = vadd.f32 %v4785_v51, %v2705_v50  ;;  %v2708_v44 = vmul.f32 %v4779_v16, %v2595_v8  ;;  %v2590_v22 = vadd.f32 %v4774_v53, %v2589_v30  ;;  %v3839_v30 = vld [vmem:[%s4074_s19 + $0xa8] sm:$0xff] }
 0x4d3   : > { %v3642_v62 = vpop.f32.mrf.mxu1 }
 0x4d4   : > { %2809 = vst.msk [vmem:[%s4796_s13 + $0x58] sm:$0xff] %vm511_vm1, %v2777_v15  ;;  %v2776_v58 = vadd.f32 %v3830_v29, %v2744_v42  ;;  %v2747_v2 = vadd.f32 %v4785_v51, %v2708_v44  ;;  %v2707_v56 = vmul.f32 %v4779_v16, %v2590_v22  ;;  %v2605_v61 = vadd.f32 %v3642_v62, %v4774_v53  ;;  %v3840_v62 = vld [vmem:[%s4074_s19 + $0xa0] sm:$0xff] }
 0x4d5   : > { %v2599_v11 = vpop.f32.mrf.mxu1 }
 0x4d6   : > { %2808 = vst.msk [vmem:[%s4796_s13 + $0x50] sm:$0xff] %vm511_vm1, %v2776_v58  ;;  %v2779_v48 = vadd.f32 %v3831_v28, %v2747_v2  ;;  %v2746_v52 = vadd.f32 %v4785_v51, %v2707_v56  ;;  %v2710_v37 = vmul.f32 %v4779_v16, %v2605_v61  ;;  %v2600_v19 = vadd.f32 %v4774_v53, %v2599_v11  ;;  %v3841_v11 = vld [vmem:[%s4074_s19 + $0xb8] sm:$0xff] }
 0x4d7   : > { %v3645_v49 = vpop.f32.mrf.mxu1 }
 0x4d8   : > { %2811 = vst.msk [vmem:[%s4796_s13 + $0x68] sm:$0xff] %vm511_vm1, %v2779_v48  ;;  %v2778_v43 = vadd.f32 %v3832_v3, %v2746_v52  ;;  %v2749_v10 = vadd.f32 %v4785_v51, %v2710_v37  ;;  %v2709_v41 = vmul.f32 %v4779_v16, %v2600_v19  ;;  %v2615_v60 = vadd.f32 %v3645_v49, %v4774_v53  ;;  %v3842_v49 = vld [vmem:[%s4074_s19 + $0xb0] sm:$0xff] }
 0x4d9   : > { %v2609_v27 = vpop.f32.mrf.mxu1 }
 0x4da   : > { %2810 = vst.msk [vmem:[%s4796_s13 + $0x60] sm:$0xff] %vm511_vm1, %v2778_v43  ;;  %v2781_v32 = vadd.f32 %v3833_v35, %v2749_v10  ;;  %v2748_v13 = vadd.f32 %v4785_v51, %v2709_v41  ;;  %v2712_v7 = vmul.f32 %v4779_v16, %v2615_v60  ;;  %v2610_v59 = vadd.f32 %v4774_v53, %v2609_v27  ;;  %v3843_v27 = vld [vmem:[%s4074_s19 + $0xc8] sm:$0xff] }
 0x4db   : > { %v3648_v9 = vpop.f32.mrf.mxu1 }
 0x4dc   : > { %2813 = vst.msk [vmem:[%s4796_s13 + $0x78] sm:$0xff] %vm511_vm1, %v2781_v32  ;;  %v2780_v20 = vadd.f32 %v3834_v54, %v2748_v13  ;;  %v2751_v39 = vadd.f32 %v4785_v51, %v2712_v7  ;;  %v2711_v21 = vmul.f32 %v4779_v16, %v2610_v59  ;;  %v2625_v26 = vadd.f32 %v3648_v9, %v4774_v53  ;;  %v3844_v9 = vld [vmem:[%s4074_s19 + $0xc0] sm:$0xff] }
 0x4dd   : > { %v2619_v45 = vpop.f32.mrf.mxu1 }
 0x4de   : > { %2812 = vst.msk [vmem:[%s4796_s13 + $0x70] sm:$0xff] %vm511_vm1, %v2780_v20  ;;  %v2783_v34 = vadd.f32 %v3835_v4, %v2751_v39  ;;  %v2750_v23 = vadd.f32 %v4785_v51, %v2711_v21  ;;  %v2714_v36 = vmul.f32 %v4779_v16, %v2625_v26  ;;  %v2620_v14 = vadd.f32 %v4774_v53, %v2619_v45  ;;  %v3845_v45 = vld [vmem:[%s4074_s19 + $0xd8] sm:$0xff] }
 0x4df   : > { %v3651_v5 = vpop.f32.mrf.mxu1 }
 0x4e0   : > { %2815 = vst.msk [vmem:[%s4796_s13 + $0x88] sm:$0xff] %vm511_vm1, %v2783_v34  ;;  %v2782_v0 = vadd.f32 %v3836_v38, %v2750_v23  ;;  %v2753_v6 = vadd.f32 %v4785_v51, %v2714_v36  ;;  %v2713_v1 = vmul.f32 %v4779_v16, %v2620_v14  ;;  %v2635_v18 = vadd.f32 %v3651_v5, %v4774_v53  ;;  %v3846_v5 = vld [vmem:[%s4074_s19 + $0xd0] sm:$0xff] }
 0x4e1   : > { %v2629_v25 = vpop.f32.mrf.mxu1 }
 0x4e2   : > { %2814 = vst.msk [vmem:[%s4796_s13 + $0x80] sm:$0xff] %vm511_vm1, %v2782_v0  ;;  %v2785_v55 = vadd.f32 %v3837_v47, %v2753_v6  ;;  %v2752_v46 = vadd.f32 %v4785_v51, %v2713_v1  ;;  %v2716_v17 = vmul.f32 %v4779_v16, %v2635_v18  ;;  %v2630_v12 = vadd.f32 %v4774_v53, %v2629_v25  ;;  %v3847_v25 = vld [vmem:[%s4074_s19 + $0xe8] sm:$0xff] }
 0x4e3   : > { %v3654_v31 = vpop.f32.mrf.mxu1 }
 0x4e4   : > { %2817 = vst.msk [vmem:[%s4796_s13 + $0x98] sm:$0xff] %vm511_vm1, %v2785_v55  ;;  %v2784_v40 = vadd.f32 %v3838_v57, %v2752_v46  ;;  %v2755_v24 = vadd.f32 %v4785_v51, %v2716_v17  ;;  %v2715_v33 = vmul.f32 %v4779_v16, %v2630_v12  ;;  %v2645_v50 = vadd.f32 %v3654_v31, %v4774_v53  ;;  %v3848_v12 = vld [vmem:[%s4074_s19 + $0xe0] sm:$0xff] }
 0x4e5   : > { %v2639_v8 = vpop.f32.mrf.mxu1 }
 0x4e6   : > { %2816 = vst.msk [vmem:[%s4796_s13 + $0x90] sm:$0xff] %vm511_vm1, %v2784_v40  ;;  %v2787_v63 = vadd.f32 %v3839_v30, %v2755_v24  ;;  %v2754_v15 = vadd.f32 %v4785_v51, %v2715_v33  ;;  %v2718_v42 = vmul.f32 %v4779_v16, %v2645_v50  ;;  %v2640_v44 = vadd.f32 %v4774_v53, %v2639_v8  ;;  %v3849_v24 = vld [vmem:[%s4074_s19 + $0xf8] sm:$0xff]  ;;  %v3850_v8 = vld [vmem:[%s4074_s19 + $0xf0] sm:$0xff] }
 0x4e7   : > { %v3657_v22 = vpop.f32.mrf.mxu1 }
 0x4e8   : > { %2819 = vst.msk [vmem:[%s4796_s13 + $0xa8] sm:$0xff] %vm511_vm1, %v2787_v63  ;;  %v2786_v29 = vadd.f32 %v3840_v62, %v2754_v15  ;;  %v2757_v58 = vadd.f32 %v4785_v51, %v2718_v42  ;;  %v2717_v2 = vmul.f32 %v4779_v16, %v2640_v44  ;;  %v2655_v56 = vadd.f32 %v3657_v22, %v4774_v53 }
 0x4e9   : > { %v2649_v61 = vpop.f32.mrf.mxu1 }
 0x4ea   : > { %2818 = vst.msk [vmem:[%s4796_s13 + $0xa0] sm:$0xff] %vm511_vm1, %v2786_v29  ;;  %v2789_v28 = vadd.f32 %v3841_v11, %v2757_v58  ;;  %v2756_v48 = vadd.f32 %v4785_v51, %v2717_v2  ;;  %v2720_v52 = vmul.f32 %v4779_v16, %v2655_v56  ;;  %v2650_v37 = vadd.f32 %v4774_v53, %v2649_v61 }
 0x4eb   : > { %v3660_v19 = vpop.f32.mrf.mxu1 }
 0x4ec   : > { %2821 = vst.msk [vmem:[%s4796_s13 + $0xb8] sm:$0xff] %vm511_vm1, %v2789_v28  ;;  %v2788_v3 = vadd.f32 %v3842_v49, %v2756_v48  ;;  %v2759_v43 = vadd.f32 %v4785_v51, %v2720_v52  ;;  %v2719_v10 = vmul.f32 %v4779_v16, %v2650_v37  ;;  %v2665_v41 = vadd.f32 %v3660_v19, %v4774_v53 }
 0x4ed   : > { %v2659_v60 = vpop.f32.mrf.mxu1 }
 0x4ee   : > { %2820 = vst.msk [vmem:[%s4796_s13 + $0xb0] sm:$0xff] %vm511_vm1, %v2788_v3  ;;  %v2791_v35 = vadd.f32 %v3843_v27, %v2759_v43  ;;  %v2758_v32 = vadd.f32 %v4785_v51, %v2719_v10  ;;  %v2722_v13 = vmul.f32 %v4779_v16, %v2665_v41  ;;  %v2660_v7 = vadd.f32 %v4774_v53, %v2659_v60 }
 0x4ef   : > { %v3663_v59 = vpop.f32.mrf.mxu1 }
 0x4f0   : > { %2823 = vst.msk [vmem:[%s4796_s13 + $0xc8] sm:$0xff] %vm511_vm1, %v2791_v35  ;;  %v2790_v54 = vadd.f32 %v3844_v9, %v2758_v32  ;;  %v2761_v20 = vadd.f32 %v4785_v51, %v2722_v13  ;;  %v2721_v39 = vmul.f32 %v4779_v16, %v2660_v7  ;;  %v2675_v21 = vadd.f32 %v3663_v59, %v4774_v53 }
 0x4f1   : > { %v2669_v26 = vpop.f32.mrf.mxu1 }
 0x4f2   : > { %2822 = vst.msk [vmem:[%s4796_s13 + $0xc0] sm:$0xff] %vm511_vm1, %v2790_v54  ;;  %v2793_v4 = vadd.f32 %v3845_v45, %v2761_v20  ;;  %v2760_v34 = vadd.f32 %v4785_v51, %v2721_v39  ;;  %v2724_v23 = vmul.f32 %v4779_v16, %v2675_v21  ;;  %v2670_v36 = vadd.f32 %v4774_v53, %v2669_v26 }
 0x4f3   : > { %v3666_v14 = vpop.f32.mrf.mxu1 }
 0x4f4   : > { %2825 = vst.msk [vmem:[%s4796_s13 + $0xd8] sm:$0xff] %vm511_vm1, %v2793_v4  ;;  %v2792_v38 = vadd.f32 %v3846_v5, %v2760_v34  ;;  %v2763_v0 = vadd.f32 %v4785_v51, %v2724_v23  ;;  %v2723_v6 = vmul.f32 %v4779_v16, %v2670_v36  ;;  %v2685_v1 = vadd.f32 %v3666_v14, %v4774_v53 }
 0x4f5   : > { %v2679_v18 = vpop.f32.mrf.mxu1 }
 0x4f6   : > { %2824 = vst.msk [vmem:[%s4796_s13 + $0xd0] sm:$0xff] %vm511_vm1, %v2792_v38  ;;  %v2795_v47 = vadd.f32 %v3847_v25, %v2763_v0  ;;  %v2762_v55 = vadd.f32 %v4785_v51, %v2723_v6  ;;  %v2726_v46 = vmul.f32 %v4779_v16, %v2685_v1  ;;  %v2680_v17 = vadd.f32 %v4774_v53, %v2679_v18 }
 0x4f8   : > { %2827 = vst.msk [vmem:[%s4796_s13 + $0xe8] sm:$0xff] %vm511_vm1, %v2795_v47  ;;  %v2794_v31 = vadd.f32 %v3848_v12, %v2762_v55  ;;  %v2765_v57 = vadd.f32 %v4785_v51, %v2726_v46  ;;  %v2725_v40 = vmul.f32 %v4779_v16, %v2680_v17 }
 0x4fa   : > { %2826 = vst.msk [vmem:[%s4796_s13 + $0xe0] sm:$0xff] %vm511_vm1, %v2794_v31  ;;  %v2797_v33 = vadd.f32 %v3849_v24, %v2765_v57  ;;  %v2764_v50 = vadd.f32 %v4785_v51, %v2725_v40 }
 0x4fc   : > { %2829 = vst.msk [vmem:[%s4796_s13 + $0xf8] sm:$0xff] %vm511_vm1, %v2797_v33  ;;  %v2796_v30 = vadd.f32 %v3850_v8, %v2764_v50 }
 0x4fe   : > { %2828 = vst.msk [vmem:[%s4796_s13 + $0xf0] sm:$0xff] %vm511_vm1, %v2796_v30 }
 0x4ff PF: > { %s22_s23 = sadd.s32 1, %s3873_s23   ;;  %s5006_s21 = smov %s3869_s22 }
 0x500   : > { %p19_p5 = scmp.ge.s32.totalorder %s22_s23, 4   ;;  %s5007_s22 = smov %s5009_s24 }
 0x502   :  { %21 = sbr.rel (!%p19_p5) target bundleno = 2 (0x2), region = 105 }

</bundles_post_ra>
